<compile_context>
chip_gen: v5e
topology: v5e:2x2
jax: 0.10.0
libtpu: 0.0.40
codegen_flags: <defaults>
</compile_context>

<pallas_src>
import functools

import jax
import jax.numpy as jnp
from jax.experimental import pallas as pl
from jax.experimental.pallas import tpu as pltpu


def _round_up(x, m):
    return -(-x // m) * m


def _default_bf16_elementwise():
    """bf16 VPU/EUP path exists on v6e/v7x; keep f32 elementwise on v5e and older."""
    try:
        kind = jax.devices()[0].device_kind.lower()
    except Exception:
        return False
    return any(tag in kind for tag in ("v6", "v7", "7x"))


# ----------------------------------------------------------------------------- kernels

def encoder_kernel(pts_ref, w1_ref, b1_ref, w2_ref, b2_ref, w3_ref, b3_ref, out_ref):
    """Pointwise MLP on one lane-dense (3, TN) point tile, max-pooled into a resident
    (F, 1) block accumulated across the innermost ("arbitrary") N-tile axis."""
    pts = pts_ref[0]                                                  # (3, TN)  f32
    w1 = w1_ref[...]                                                  # (EH, 3)  f32

    # K=3 input layer as three VPU broadcast-FMAs (lane-dense, no cross-lane broadcast).
    h = (w1[:, 0:1] * pts[0:1, :] +
         w1[:, 1:2] * pts[1:2, :] +
         w1[:, 2:3] * pts[2:3, :] + b1_ref[...])                      # (EH, TN)
    h = jnp.maximum(h, 0.0)

    # bf16 MXU matmuls with f32 accumulation (weights pre-transposed to (out, in)).
    h = jnp.dot(w2_ref[...], h.astype(jnp.bfloat16),
                preferred_element_type=jnp.float32) + b2_ref[...]     # (EH, TN)
    h = jnp.maximum(h, 0.0)
    h = jnp.dot(w3_ref[...], h.astype(jnp.bfloat16),
                preferred_element_type=jnp.float32) + b3_ref[...]     # (F, TN)

    tile_max = jnp.max(h, axis=-1, keepdims=True)                     # (F, 1)

    @pl.when(pl.program_id(2) == 0)
    def _():
        out_ref[...] = jnp.full(out_ref.shape, -jnp.inf, out_ref.dtype)

    out_ref[0, 0] = jnp.maximum(out_ref[0, 0], tile_max)              # resident (F, 1)


def film_siren_kernel(pts_ref, film_ref, win_ref, wh_ref, wout_ref, bout_ref, out_ref,
                      *, n_layers, ew_dtype):
    """FiLM-SIREN decoder on one lane-dense (3, TN) point tile.

    Activations stay transposed (H, TN); FiLM gamma/beta' are (H, 1) lane-broadcast
    columns (the per-layer biases are pre-folded into beta' in the wrapper); the FiLM
    modulation + sin run in ew_dtype (bf16 on v6e/v7x, f32 on v5e); the width-1 head is a
    VPU multiply + sublane reduce producing a lane-dense (1, TN) output row.
    """
    pts = pts_ref[0]                                                  # (3, TN)  f32
    film = film_ref[0]                                                # (H, 2L)  f32
    win = win_ref[...]                                                # (H, 3)   f32

    # First sine layer (K=3): VPU broadcast-FMAs; bias folded into beta'.
    z = (win[:, 0:1] * pts[0:1, :] +
         win[:, 1:2] * pts[1:2, :] +
         win[:, 2:3] * pts[2:3, :])                                   # (H, TN) f32
    g = film[:, 0:1].astype(ew_dtype)
    b = film[:, 1:2].astype(ew_dtype)
    h = jnp.sin(g * z.astype(ew_dtype) + b)                           # (H, TN) ew_dtype

    # Hidden sine layers: bf16 MXU matmul, f32 accumulate, FiLM + sin in ew_dtype.
    for l in range(n_layers - 1):
        z = jnp.dot(wh_ref[l], h.astype(jnp.bfloat16),
                    preferred_element_type=jnp.float32)               # (H, TN) f32
        g = film[:, 2 * (l + 1):2 * (l + 1) + 1].astype(ew_dtype)
        b = film[:, 2 * (l + 1) + 1:2 * (l + 1) + 2].astype(ew_dtype)
        h = jnp.sin(g * z.astype(ew_dtype) + b)

    # Linear head: multiply (promotes to f32) + sublane reduce -> lane-dense (1, TN) row.
    out = jnp.sum(h * wout_ref[...], axis=0, keepdims=True) + bout_ref[...]
    out_ref[0] = out                                                  # (1, TN)


# ----------------------------------------------------------------------------- module

class ShapeNetworkPallas:
    def __init__(self, feat_dim=128, enc_hidden=128,
                 decoder_hidden_dim=256, decoder_n_hidden_layers=5,
                 enc_tile=2048, dec_tile=1024, enc_splits=2,
                 bf16_elementwise=None, seed=0):
        self.feat_dim = feat_dim
        self.enc_hidden = enc_hidden
        self.hidden = decoder_hidden_dim
        self.n_layers = decoder_n_hidden_layers
        self.enc_tile = enc_tile
        self.dec_tile = dec_tile
        self.enc_splits = enc_splits
        if bf16_elementwise is None:
            bf16_elementwise = _default_bf16_elementwise()
        self.ew_dtype = jnp.bfloat16 if bf16_elementwise else jnp.float32
        self.params = self._init_params(seed)

    # -- parameters (f32 masters; bf16 MXU copies are cast at call time) ----------
    def _init_params(self, seed):
        key = jax.random.PRNGKey(seed)
        ks = list(jax.random.split(key, 12))
        F, EH, H, L = self.feat_dim, self.enc_hidden, self.hidden, self.n_layers
        omega0 = 30.0

        def uni(k, shape, bound):
            return jax.random.uniform(k, shape, jnp.float32, -bound, bound)

        p = {}
        # encoder (pointwise Conv1d == per-point linear), stored (out, in): 3->EH->EH->F
        p['e_w1'] = uni(ks[0], (EH, 3), 1.0 / jnp.sqrt(3.0))
        p['e_b1'] = jnp.zeros((EH, 1), jnp.float32)
        p['e_w2'] = uni(ks[1], (EH, EH), 1.0 / jnp.sqrt(EH))
        p['e_b2'] = jnp.zeros((EH, 1), jnp.float32)
        p['e_w3'] = uni(ks[2], (F, EH), 1.0 / jnp.sqrt(EH))
        p['e_b3'] = jnp.zeros((F, 1), jnp.float32)

        # FiLM generator: F -> 2*L*H (evaluated in plain JAX; gamma ~ 1 via bias init)
        p['d_wf'] = uni(ks[3], (F, 2 * L * H), 1.0 / jnp.sqrt(F))
        p['d_bf'] = jnp.tile(
            jnp.concatenate([jnp.ones((H,), jnp.float32),
                             jnp.zeros((H,), jnp.float32)]), L)        # (2*L*H,)

        # SIREN layers in (out, in) layout; omega0 folded into first-layer init.
        # TODO(synk): omega0 placement matches the previous implementation; verify
        # against the reference FilmSiren once its class body is available.
        p['d_win'] = uni(ks[4], (H, 3), omega0 / 3.0)
        p['d_bin'] = uni(ks[5], (H, 1), 1.0 / 3.0)
        wh_bound = jnp.sqrt(6.0 / H) / omega0
        p['d_wh'] = uni(ks[6], (L - 1, H, H), wh_bound)
        p['d_bh'] = uni(ks[7], (L - 1, H, 1), wh_bound)
        p['d_wout'] = uni(ks[8], (H, 1), jnp.sqrt(6.0 / H))
        p['d_bout'] = jnp.zeros((1, 1), jnp.float32)
        return p

    @staticmethod
    def _full_spec(arr):
        nd = arr.ndim
        return pl.BlockSpec(arr.shape, lambda *_: (0,) * nd)

    # -- encoder.encode ------------------------------------------------------------
    def _encode(self, pts):
        """pts: (B, N, 3) -> global feature (B, F)."""
        B, N, _ = pts.shape
        p = self.params
        F = self.feat_dim

        pts_t = jnp.transpose(pts, (0, 2, 1))                         # (B, 3, N) lane-dense
        TN = min(self.enc_tile, _round_up(N, 128))
        n_tiles = -(-N // TN)
        S = max(1, min(self.enc_splits, n_tiles))                     # megacore split axis
        n_tiles = _round_up(n_tiles, S)
        n_pad = n_tiles * TN
        if n_pad != N:
            # edge-pad (repeat last point) so the max-pool is unaffected by padding
            pts_t = jnp.pad(pts_t, ((0, 0), (0, 0), (0, n_pad - N)), mode='edge')
        T = n_tiles // S

        out = pl.pallas_call(
            encoder_kernel,
            out_shape=jax.ShapeDtypeStruct((B, S, F, 1), jnp.float32),
            grid_spec=pltpu.PrefetchScalarGridSpec(
                num_scalar_prefetch=0,
                grid=(B, S, T),
                in_specs=[
                    pl.BlockSpec((1, 3, TN), lambda b, s, t: (b, 0, s * T + t)),
                    self._full_spec(p['e_w1']), self._full_spec(p['e_b1']),
                    self._full_spec(p['e_w2']), self._full_spec(p['e_b2']),
                    self._full_spec(p['e_w3']), self._full_spec(p['e_b3']),
                ],
                out_specs=pl.BlockSpec((1, 1, F, 1), lambda b, s, t: (b, s, 0, 0)),
            ),
            compiler_params=pltpu.CompilerParams(
                dimension_semantics=("parallel", "parallel", "arbitrary"),
                vmem_limit_bytes=32 * 1024 * 1024),
        )(pts_t,
          p['e_w1'], p['e_b1'],
          p['e_w2'].astype(jnp.bfloat16), p['e_b2'],
          p['e_w3'].astype(jnp.bfloat16), p['e_b3'])

        return jnp.max(out[..., 0], axis=1)                           # (B, F)

    # -- FiLM generator (hoisted; tiny M=1 matmul) + layer-bias folding ------------
    def _film_params(self, feat):
        """feat: (B, F) -> folded FiLM table (B, H, 2L), columns [g_0, b'_0, g_1, ...]."""
        p = self.params
        B = feat.shape[0]
        H, L = self.hidden, self.n_layers
        film = jnp.dot(feat, p['d_wf']) + p['d_bf']                   # (B, 2LH)
        film = film.reshape(B, L, 2, H)
        gammas = film[:, :, 0, :]                                     # (B, L, H)
        betas = film[:, :, 1, :]                                      # (B, L, H)
        # fold per-layer biases: sin(g*(Wx + b) + beta) == sin(g*(Wx) + (g*b + beta))
        layer_b = jnp.concatenate([p['d_bin'].T, p['d_bh'][:, :, 0]], axis=0)  # (L, H)
        betas = gammas * layer_b[None] + betas
        folded = jnp.stack([gammas, betas], axis=2).reshape(B, 2 * L, H)
        return jnp.transpose(folded, (0, 2, 1))                       # (B, H, 2L)

    # -- decoder (query_feature broadcast fused; all point sets in one call) -------
    def _decode(self, pts_t, film_t):
        """pts_t: (B, 3, Ntot), film_t: (B, H, 2L) -> SDF (B, Ntot)."""
        B, _, ntot = pts_t.shape
        H, L = self.hidden, self.n_layers
        TN = min(self.dec_tile, _round_up(ntot, 128))
        n_pad = _round_up(ntot, TN)
        if n_pad != ntot:
            pts_t = jnp.pad(pts_t, ((0, 0), (0, 0), (0, n_pad - ntot)), mode='edge')
        p = self.params

        kernel = functools.partial(film_siren_kernel, n_layers=L, ew_dtype=self.ew_dtype)

        flops = int(B * n_pad * (8 * H + (L - 1) * 2 * H * H))
        transcendentals = int(B * n_pad * L * H)
        bytes_accessed = int(B * n_pad * 4 * 4 + B * H * 2 * L * 4
                             + (L - 1) * H * H * 2 + H * 8 * 4)

        out = pl.pallas_call(
            kernel,
            out_shape=jax.ShapeDtypeStruct((B, 1, n_pad), jnp.float32),
            grid_spec=pltpu.PrefetchScalarGridSpec(
                num_scalar_prefetch=0,
                grid=(B, n_pad // TN),
                in_specs=[
                    pl.BlockSpec((1, 3, TN), lambda b, n: (b, 0, n)),
                    pl.BlockSpec((1, H, 2 * L), lambda b, n: (b, 0, 0)),
                    self._full_spec(p['d_win']),
                    self._full_spec(p['d_wh']),
                    self._full_spec(p['d_wout']),
                    self._full_spec(p['d_bout']),
                ],
                out_specs=pl.BlockSpec((1, 1, TN), lambda b, n: (b, 0, n)),
            ),
            compiler_params=pltpu.CompilerParams(
                dimension_semantics=("parallel", "parallel"),
                vmem_limit_bytes=32 * 1024 * 1024),
            cost_estimate=pl.CostEstimate(flops=flops,
                                          transcendentals=transcendentals,
                                          bytes_accessed=bytes_accessed),
        )(pts_t, film_t,
          p['d_win'],
          p['d_wh'].astype(jnp.bfloat16),
          p['d_wout'], p['d_bout'])
        return out[:, 0, :ntot]

    # -- forward (mirrors ShapeNetwork.forward_dense) ------------------------------
    def forward(self, non_mnfld_pnts=None, mnfld_pnts=None, near_points=None):
        latent_reg = None
        global_feat = self._encode(mnfld_pnts)                        # (B, F)
        film_t = self._film_params(global_feat)                       # (B, H, 2L)

        names = ['manifold_pnts_pred', 'nonmanifold_pnts_pred', 'near_points_pred']
        point_sets = [mnfld_pnts, non_mnfld_pnts, near_points]
        active = [(nm, pts) for nm, pts in zip(names, point_sets) if pts is not None]

        # Fuse all decode calls into one pallas_call: concat point sets along N.
        # TODO(synk): this transpose+concat is an extra HBM pass over the points; callers
        # that already hold (B, 3, N) data could feed the kernel via per-set offsets.
        pts_all = jnp.concatenate(
            [jnp.transpose(pts, (0, 2, 1)) for _, pts in active], axis=2)  # (B, 3, Ntot)
        sdf_all = self._decode(pts_all, film_t)                            # (B, Ntot)

        results = {nm: None for nm in names}
        off = 0
        for nm, pts in active:
            n = pts.shape[1]
            results[nm] = sdf_all[:, off:off + n][..., None]               # (B, N, 1)
            off += n
        results['latent_reg'] = latent_reg
        return results


# ----------------------------------------------------------------------------- main

if __name__ == "__main__":
    key = jax.random.PRNGKey(0)
    k1, k2, k3 = jax.random.split(key, 3)

    B, N = 2, 256
    mnfld_pnts = jax.random.normal(k1, (B, N, 3), jnp.float32)
    non_mnfld_pnts = jax.random.uniform(k2, (B, N, 3), jnp.float32, -1.0, 1.0)
    near_points = mnfld_pnts + 0.05 * jax.random.normal(k3, (B, N, 3), jnp.float32)

    net = ShapeNetworkPallas(feat_dim=128, enc_hidden=128,
                             decoder_hidden_dim=256, decoder_n_hidden_layers=5,
                             seed=0)

    out = net.forward(non_mnfld_pnts=non_mnfld_pnts,
                      mnfld_pnts=mnfld_pnts,
                      near_points=near_points)

    jax.block_until_ready(out['manifold_pnts_pred'])
    jax.block_until_ready(out['nonmanifold_pnts_pred'])
    jax.block_until_ready(out['near_points_pred'])

    assert out['manifold_pnts_pred'].shape == (B, N, 1)
    assert out['nonmanifold_pnts_pred'].shape == (B, N, 1)
    assert out['near_points_pred'].shape == (B, N, 1)
    assert out['latent_reg'] is None
    assert bool(jnp.all(jnp.isfinite(out['manifold_pnts_pred'])))
    assert bool(jnp.all(jnp.isfinite(out['nonmanifold_pnts_pred'])))
    assert bool(jnp.all(jnp.isfinite(out['near_points_pred'])))

    print("KERNEL_OK")
</pallas_src>

<mosaic_0001>
module attributes {stable_mosaic.version = 11 : i64} {
  func.func @encoder_kernel(%arg0: i32, %arg1: i32, %arg2: i32, %arg3: memref<1x3x256xf32, #tpu.memory_space<vmem>>, %arg4: memref<128x3xf32, #tpu.memory_space<vmem>>, %arg5: memref<128x1xf32, #tpu.memory_space<vmem>>, %arg6: memref<128x128xbf16, #tpu.memory_space<vmem>>, %arg7: memref<128x1xf32, #tpu.memory_space<vmem>>, %arg8: memref<128x128xbf16, #tpu.memory_space<vmem>>, %arg9: memref<128x1xf32, #tpu.memory_space<vmem>>, %arg10: memref<1x1x128x1xf32, #tpu.memory_space<vmem>>) attributes {dimension_semantics = [#tpu.dimension_semantics<parallel>, #tpu.dimension_semantics<parallel>, #tpu.dimension_semantics<arbitrary>], iteration_bounds = array<i64: 2, 1, 1>, scalar_prefetch = 0 : i64, scratch_operands = 0 : i64, tpu.core_type = #tpu.core_type<tc>, window_params = [{transform_indices = @transform_0, window_bounds = array<i64: 1, 3, 256>}, {pipeline_mode = #tpu.pipeline_mode<synchronous>, transform_indices = @transform_1, window_bounds = array<i64: 128, 3>}, {pipeline_mode = #tpu.pipeline_mode<synchronous>, transform_indices = @transform_2, window_bounds = array<i64: 128, 1>}, {pipeline_mode = #tpu.pipeline_mode<synchronous>, transform_indices = @transform_3, window_bounds = array<i64: 128, 128>}, {pipeline_mode = #tpu.pipeline_mode<synchronous>, transform_indices = @transform_4, window_bounds = array<i64: 128, 1>}, {pipeline_mode = #tpu.pipeline_mode<synchronous>, transform_indices = @transform_5, window_bounds = array<i64: 128, 128>}, {pipeline_mode = #tpu.pipeline_mode<synchronous>, transform_indices = @transform_6, window_bounds = array<i64: 128, 1>}, {transform_indices = @transform_7, window_bounds = array<i64: 1, 1, 128, 1>}]} {
    %c0 = arith.constant 0 : index
    %c0_0 = arith.constant 0 : index
    %c0_1 = arith.constant 0 : index
    %0 = vector.load %arg3[%c0, %c0_0, %c0_1] : memref<1x3x256xf32, #tpu.memory_space<vmem>>, vector<1x3x256xf32>
    %1 = vector.shape_cast %0 : vector<1x3x256xf32> to vector<3x256xf32>
    %c0_2 = arith.constant 0 : index
    %c0_3 = arith.constant 0 : index
    %2 = vector.load %arg4[%c0_2, %c0_3] : memref<128x3xf32, #tpu.memory_space<vmem>>, vector<128x3xf32>
    %3 = vector.extract_strided_slice %2 {offsets = [0, 0], sizes = [128, 1], strides = [1, 1]} : vector<128x3xf32> to vector<128x1xf32>
    %4 = vector.extract_strided_slice %1 {offsets = [0, 0], sizes = [1, 256], strides = [1, 1]} : vector<3x256xf32> to vector<1x256xf32>
    %5 = vector.broadcast %3 : vector<128x1xf32> to vector<128x256xf32>
    %6 = vector.broadcast %4 : vector<1x256xf32> to vector<128x256xf32>
    %7 = arith.mulf %5, %6 : vector<128x256xf32>
    %8 = vector.extract_strided_slice %2 {offsets = [0, 1], sizes = [128, 1], strides = [1, 1]} : vector<128x3xf32> to vector<128x1xf32>
    %9 = vector.extract_strided_slice %1 {offsets = [1, 0], sizes = [1, 256], strides = [1, 1]} : vector<3x256xf32> to vector<1x256xf32>
    %10 = vector.broadcast %8 : vector<128x1xf32> to vector<128x256xf32>
    %11 = vector.broadcast %9 : vector<1x256xf32> to vector<128x256xf32>
    %12 = arith.mulf %10, %11 : vector<128x256xf32>
    %13 = arith.addf %7, %12 : vector<128x256xf32>
    %14 = vector.extract_strided_slice %2 {offsets = [0, 2], sizes = [128, 1], strides = [1, 1]} : vector<128x3xf32> to vector<128x1xf32>
    %15 = vector.extract_strided_slice %1 {offsets = [2, 0], sizes = [1, 256], strides = [1, 1]} : vector<3x256xf32> to vector<1x256xf32>
    %16 = vector.broadcast %14 : vector<128x1xf32> to vector<128x256xf32>
    %17 = vector.broadcast %15 : vector<1x256xf32> to vector<128x256xf32>
    %18 = arith.mulf %16, %17 : vector<128x256xf32>
    %19 = arith.addf %13, %18 : vector<128x256xf32>
    %c0_4 = arith.constant 0 : index
    %c0_5 = arith.constant 0 : index
    %20 = vector.load %arg5[%c0_4, %c0_5] : memref<128x1xf32, #tpu.memory_space<vmem>>, vector<128x1xf32>
    %21 = vector.broadcast %20 : vector<128x1xf32> to vector<128x256xf32>
    %22 = arith.addf %19, %21 : vector<128x256xf32>
    %cst = arith.constant 0.000000e+00 : f32
    %23 = vector.broadcast %cst : f32 to vector<128x256xf32>
    %24 = arith.maximumf %22, %23 : vector<128x256xf32>
    %c0_6 = arith.constant 0 : index
    %c0_7 = arith.constant 0 : index
    %25 = vector.load %arg6[%c0_6, %c0_7] : memref<128x128xbf16, #tpu.memory_space<vmem>>, vector<128x128xbf16>
    %26 = arith.truncf %24 : vector<128x256xf32> to vector<128x256xbf16>
    %cst_8 = arith.constant dense<0.000000e+00> : vector<128x256xf32>
    %27 = tpu.matmul %25, %26, %cst_8 {dimension_numbers = #tpu.dot_dimension_numbers<[1], [0], [0], [1], [0, 0, 1, 1], [], []>} : vector<128x128xbf16>, vector<128x256xbf16>, vector<128x256xf32> -> vector<128x256xf32>
    %c0_9 = arith.constant 0 : index
    %c0_10 = arith.constant 0 : index
    %28 = vector.load %arg7[%c0_9, %c0_10] : memref<128x1xf32, #tpu.memory_space<vmem>>, vector<128x1xf32>
    %29 = vector.broadcast %28 : vector<128x1xf32> to vector<128x256xf32>
    %30 = arith.addf %27, %29 : vector<128x256xf32>
    %cst_11 = arith.constant 0.000000e+00 : f32
    %31 = vector.broadcast %cst_11 : f32 to vector<128x256xf32>
    %32 = arith.maximumf %30, %31 : vector<128x256xf32>
    %c0_12 = arith.constant 0 : index
    %c0_13 = arith.constant 0 : index
    %33 = vector.load %arg8[%c0_12, %c0_13] : memref<128x128xbf16, #tpu.memory_space<vmem>>, vector<128x128xbf16>
    %34 = arith.truncf %32 : vector<128x256xf32> to vector<128x256xbf16>
    %cst_14 = arith.constant dense<0.000000e+00> : vector<128x256xf32>
    %35 = tpu.matmul %33, %34, %cst_14 {dimension_numbers = #tpu.dot_dimension_numbers<[1], [0], [0], [1], [0, 0, 1, 1], [], []>} : vector<128x128xbf16>, vector<128x256xbf16>, vector<128x256xf32> -> vector<128x256xf32>
    %c0_15 = arith.constant 0 : index
    %c0_16 = arith.constant 0 : index
    %36 = vector.load %arg9[%c0_15, %c0_16] : memref<128x1xf32, #tpu.memory_space<vmem>>, vector<128x1xf32>
    %37 = vector.broadcast %36 : vector<128x1xf32> to vector<128x256xf32>
    %38 = arith.addf %35, %37 : vector<128x256xf32>
    %cst_17 = arith.constant dense<0xFF800000> : vector<128xf32>
    %39 = vector.multi_reduction <maximumf>, %38, %cst_17 [1] : vector<128x256xf32> to vector<128xf32>
    %40 = vector.shape_cast %39 : vector<128xf32> to vector<128x1xf32>
    %c0_i32 = arith.constant 0 : i32
    %41 = arith.cmpi eq, %arg2, %c0_i32 : i32
    %42 = arith.extui %41 : i1 to i32
    %c0_i32_18 = arith.constant 0 : i32
    %43 = arith.cmpi ne, %42, %c0_i32_18 : i32
    scf.if %43 {
      %cst_27 = arith.constant 0xFF800000 : f32
      %50 = vector.broadcast %cst_27 : f32 to vector<1x1x128x1xf32>
      %c0_28 = arith.constant 0 : index
      %c0_29 = arith.constant 0 : index
      %c0_30 = arith.constant 0 : index
      %c0_31 = arith.constant 0 : index
      %51 = vector.load %arg10[%c0_28, %c0_29, %c0_30, %c0_31] : memref<1x1x128x1xf32, #tpu.memory_space<vmem>>, vector<1x1x128x1xf32>
      tpu.vector_store %arg10[%c0_28, %c0_29, %c0_30, %c0_31], %50 {strides = array<i32>} : memref<1x1x128x1xf32, #tpu.memory_space<vmem>>, vector<1x1x128x1xf32>,
    } else {
    }
    %c0_19 = arith.constant 0 : index
    %c0_20 = arith.constant 0 : index
    %c0_21 = arith.constant 0 : index
    %c0_22 = arith.constant 0 : index
    %44 = vector.load %arg10[%c0_19, %c0_20, %c0_21, %c0_22] : memref<1x1x128x1xf32, #tpu.memory_space<vmem>>, vector<1x1x128x1xf32>
    %45 = vector.shape_cast %44 : vector<1x1x128x1xf32> to vector<128x1xf32>
    %46 = arith.maximumf %45, %40 : vector<128x1xf32>
    %c0_23 = arith.constant 0 : index
    %c0_24 = arith.constant 0 : index
    %c0_25 = arith.constant 0 : index
    %c0_26 = arith.constant 0 : index
    %47 = vector.load %arg10[%c0_23, %c0_24, %c0_25, %c0_26] : memref<1x1x128x1xf32, #tpu.memory_space<vmem>>, vector<1x1x128x1xf32>
    %48 = vector.shape_cast %47 : vector<1x1x128x1xf32> to vector<128x1xf32>
    %49 = vector.shape_cast %46 : vector<128x1xf32> to vector<1x1x128x1xf32>
    tpu.vector_store %arg10[%c0_23, %c0_24, %c0_25, %c0_26], %49 {strides = array<i32>} : memref<1x1x128x1xf32, #tpu.memory_space<vmem>>, vector<1x1x128x1xf32>,
    return
  }
  func.func @transform_0(%arg0: i32, %arg1: i32, %arg2: i32) -> (i32, i32, i32) {
    %c1_i32 = arith.constant 1 : i32
    %0 = arith.muli %arg1, %c1_i32 : i32
    %1 = arith.addi %0, %arg2 : i32
    %c0_i32 = arith.constant 0 : i32
    %c0_i32_0 = arith.constant 0 : i32
    return %arg0, %c0_i32, %1 : i32, i32, i32
  }
  func.func @transform_1(%arg0: i32, %arg1: i32, %arg2: i32) -> (i32, i32) {
    %c0_i32 = arith.constant 0 : i32
    %c0_i32_0 = arith.constant 0 : i32
    %c0_i32_1 = arith.constant 0 : i32
    return %c0_i32, %c0_i32_0 : i32, i32
  }
  func.func @transform_2(%arg0: i32, %arg1: i32, %arg2: i32) -> (i32, i32) {
    %c0_i32 = arith.constant 0 : i32
    %c0_i32_0 = arith.constant 0 : i32
    %c0_i32_1 = arith.constant 0 : i32
    return %c0_i32, %c0_i32_0 : i32, i32
  }
  func.func @transform_3(%arg0: i32, %arg1: i32, %arg2: i32) -> (i32, i32) {
    %c0_i32 = arith.constant 0 : i32
    %c0_i32_0 = arith.constant 0 : i32
    %c0_i32_1 = arith.constant 0 : i32
    return %c0_i32, %c0_i32_0 : i32, i32
  }
  func.func @transform_4(%arg0: i32, %arg1: i32, %arg2: i32) -> (i32, i32) {
    %c0_i32 = arith.constant 0 : i32
    %c0_i32_0 = arith.constant 0 : i32
    %c0_i32_1 = arith.constant 0 : i32
    return %c0_i32, %c0_i32_0 : i32, i32
  }
  func.func @transform_5(%arg0: i32, %arg1: i32, %arg2: i32) -> (i32, i32) {
    %c0_i32 = arith.constant 0 : i32
    %c0_i32_0 = arith.constant 0 : i32
    %c0_i32_1 = arith.constant 0 : i32
    return %c0_i32, %c0_i32_0 : i32, i32
  }
  func.func @transform_6(%arg0: i32, %arg1: i32, %arg2: i32) -> (i32, i32) {
    %c0_i32 = arith.constant 0 : i32
    %c0_i32_0 = arith.constant 0 : i32
    %c0_i32_1 = arith.constant 0 : i32
    return %c0_i32, %c0_i32_0 : i32, i32
  }
  func.func @transform_7(%arg0: i32, %arg1: i32, %arg2: i32) -> (i32, i32, i32, i32) {
    %c0_i32 = arith.constant 0 : i32
    %c0_i32_0 = arith.constant 0 : i32
    %c0_i32_1 = arith.constant 0 : i32
    return %arg0, %arg1, %c0_i32, %c0_i32_0 : i32, i32, i32, i32
  }
}

</mosaic_0001>

<bundles_post_ra>
// kernel: tpu_custom_call.1
= control target key start
LH: loop header
LB: loop body
LE: loop exit
PB: predicated region body
PF: predicated region fallthrough
CT: control target
= control target key end

     0   :  { %s1917_s24 = smov 0   ;;  %s1919_s25 = smov 0   ;;  %s2631_s0 = inlined_call_operand.vmem [shape: f32[2,3,256], index: 0, kind: input, shape index: {}]   ;;  %s2632_s1 = inlined_call_operand.vmem [shape: f32[128,3], index: 1, kind: input, shape index: {}]   ;;  %s2633_s2 = inlined_call_operand.vmem [shape: f32[128,1], index: 2, kind: input, shape index: {}]   ;;  %s2634_s3 = inlined_call_operand.vmem [shape: bf16[128,128], index: 3, kind: input, shape index: {}]   ;;  %s2635_s4 = inlined_call_operand.vmem [shape: f32[128,1], index: 4, kind: input, shape index: {}]   ;;  %s2636_s5 = inlined_call_operand.vmem [shape: bf16[128,128], index: 5, kind: input, shape index: {}]   ;;  %s2637_s6 = inlined_call_operand.vmem [shape: f32[128,1], index: 6, kind: input, shape index: {}]   ;;  %s2638_s7 = inlined_call_operand.vmem [shape: f32[2,1,128,1], index: 7, kind: output, shape index: {}]  }
   0x1   :  { %s1921_s26 = smov 0  }
   0x2 LB: > { %s36_s27 = sadd.s32 1, %s1867_s25  ;;  %p1689_p0 = scmp.ge.s32.totalorder %s1871_s26, 1  ;;  %s1871_s26 = sphi %s1921_s26, %s17_s26   ;;  %s1867_s25 = sphi %s1919_s25, %s2640_s25   ;;  %s1863_s24 = sphi %s1917_s24, %s2639_s24  }
   0x3   : > { %p38_p1 = scmp.ge.s32.totalorder %s36_s27, 2  ;;  %p269_p2 = scmp.lt.s32.totalorder %s1871_s26, 3 }
   0x5   : > { %s2642_s27 = smov (%p38_p1, %s36_s27), 0  ;;  %p270_p3 = pnand %p1689_p0, %p269_p2 }
   0x6   : > { %p312_p4 = scmp.lt.s32.totalorder (!%p270_p3), %s1863_s24, 1 }
   0x7   : > { %273 = sbr.rel (%p270_p3) target bundleno = 1007 (0x3ef), region = 48 }
   0xc   : > { %v346_v0 = vld [vmem:[%s2632_s1 + $0x70] sm:$0xff]  ;;  %v345_v1 = vld [vmem:[%s2632_s1 + $0x68] sm:$0xff]  ;;  %v1873_v2 = vmov 2   ;;  %v1874_v3 = vmov 1   ;;  %v347_v4 = vld [vmem:[%s2632_s1 + $0x78] sm:$0xff]  ;;  %v1875_v8 = vmov 0  }
   0xd   : > { %1807 = vset.pattern.permute.xlu2 %v1873_v2  ;;  %1810 = vset.pattern.permute.xlu0 %v1874_v3  ;;  %v340_v5 = vld [vmem:[%s2632_s1 + $0x40] sm:$0xff]  ;;  %v343_v7 = vld [vmem:[%s2632_s1 + $0x58] sm:$0xff]  ;;  %v338_v9 = vld [vmem:[%s2632_s1 + $0x30] sm:$0xff]  ;;  %s2644_s24 = smov (!%p312_p4, %s1863_s24), 1  ;;  %vm1527_vm0 = vcmask 7168  }
   0xe   : > { %1806 = vset.pattern.permute.xlu1 %v1874_v3  ;;  %658 = vperm.xlu2 %1807, %v346_v0   ;;  %v344_v6 = vld [vmem:[%s2632_s1 + $0x60] sm:$0xff]  ;;  %v1969_v10 = vld [vmem:[%s2632_s1 + $0x10] sm:$0xff]  ;;  %v750_v12 = vld [vmem:[%s2633_s2 + $0x78] sm:$0xff]  ;;  %s1760_s23 = sshll.u32 %s2644_s24, 3  ;;  %s1761_s17 = sshll.u32 %s2644_s24, 7 }
   0xf   : > { %524 = vperm.xlu1 %1806, %v346_v0   ;;  %520 = vperm.xlu0 %1810, %v345_v1   ;;  %v749_v11 = vld [vmem:[%s2633_s2 + $0x70] sm:$0xff]  ;;  %v747_v14 = vld [vmem:[%s2633_s2 + $0x60] sm:$0xff]  ;;  %v748_v15 = vld [vmem:[%s2633_s2 + $0x68] sm:$0xff]  ;;  %s319_s9 = scalar_lea.vmem %s2631_s0, %s1760_s23  ;;  %s2540_s20 = scalar_lea.vmem %s2638_s7, %s1761_s17 }
  0x10   : > { %v342_v13 = vld [vmem:[%s2632_s1 + $0x50] sm:$0xff]  ;;  %v341_v16 = vld [vmem:[%s2632_s1 + $0x48] sm:$0xff]  ;;  %v746_v17 = vld [vmem:[%s2633_s2 + $0x58] sm:$0xff] }
  0x11   : > { %v337_v18 = vld [vmem:[%s2632_s1 + $0x28] sm:$0xff]  ;;  %v745_v19 = vld [vmem:[%s2633_s2 + $0x50] sm:$0xff]  ;;  %v339_v22 = vld [vmem:[%s2632_s1 + $0x38] sm:$0xff] }
  0x12   : > { %v741_v20 = vld [vmem:[%s2633_s2 + $0x30] sm:$0xff]  ;;  %v2023_v23 = vld [vmem:[%s2632_s1 + $0x18] sm:$0xff]  ;;  %v2032_v25 = vld [vmem:[%s2632_s1 + $0x8] sm:$0xff] }
  0x13   : > { %v743_v27 = vld [vmem:[%s2633_s2 + $0x40] sm:$0xff]  ;;  %v737_v28 = vld [vmem:[%s2633_s2 + $0x10] sm:$0xff]  ;;  %v736_v33 = vld [vmem:[%s2633_s2 + $0x8] sm:$0xff] }
  0x14   : > { %v336_v32 = vld [vmem:[%s2632_s1 + $0x20] sm:$0xff]  ;;  %v744_v34 = vld [vmem:[%s2633_s2 + $0x48] sm:$0xff]  ;;  %v938_v41 = vld [vmem:[%s2635_s4 + $0x58] sm:$0xff] }
  0x15   : > { %v939_v37 = vld [vmem:[%s2635_s4 + $0x60] sm:$0xff]  ;;  %v933_v45 = vld [vmem:[%s2635_s4 + $0x30] sm:$0xff]  ;;  %v742_v48 = vld [vmem:[%s2633_s2 + $0x38] sm:$0xff] }
  0x16   : > { %662 = vperm.xlu2 %1807, %v347_v4   ;;  %v331_v46 = vld [vmem:[%s319_s9] sm:$0x77]  ;;  %v932_v55 = vld [vmem:[%s2635_s4 + $0x28] sm:$0xff] }
  0x17   : > { %528 = vperm.xlu1 %1806, %v347_v4   ;;  %500 = vperm.xlu0 %1810, %v340_v5   ;;  %v531_v51 = vperm.slane %v331_v46, 1  ;;  %v532_v52 = vperm.slane %v331_v46, 5  ;;  %v429_v53 = vperm.slane %v331_v46, 0  ;;  %v430_v54 = vperm.slane %v331_v46, 4 }
  0x18   : > { %v665_v56 = vperm.slane %v331_v46, 2  ;;  %v666_v57 = vperm.slane %v331_v46, 6 }
  0x19   : > { %v2112_v58 = vperm.slane %v531_v51, 1  ;;  %v2114_v59 = vperm.slane %v532_v52, 1  ;;  %v2116_v60 = vperm.slane %v429_v53, 0  ;;  %v2118_v61 = vperm.slane %v430_v54, 0 }
  0x1e   : > { %1809 = vset.pattern.permute.xlu2 %v1874_v3 }
  0x1f   : > { %1808 = vset.pattern.permute.xlu1 %v1875_v8  ;;  %1820 = vset.pattern.permute.xlu0 %v1873_v2 }
  0x20   : > { %415 = vperm.xlu1 %1808, %v345_v1   ;;  %516 = vperm.xlu2 %1809, %v344_v6  }
  0x21   : > { %646 = vperm.xlu0 %1820, %v343_v7  }
  0x28   : > { %1811 = vset.pattern.permute.xlu1 %v1873_v2  ;;  %1812 = vset.pattern.permute.xlu2 %v1873_v2 }
  0x29   : > { %626 = vperm.xlu0 %1820, %v338_v9   ;;  %650 = vperm.xlu1 %1811, %v344_v6  }
  0x2a   : > { %654 = vperm.xlu2 %1812, %v345_v1  }
  0x31   : > { %610 = vperm.xlu0 %1820, %v1969_v10   ;;  %1813 = vset.pattern.permute.xlu1 %v1875_v8 }
  0x32   : > { %1814 = vset.pattern.permute.xlu2 %v1875_v8  ;;  %823 = vperm.xlu1 %1813, %v749_v11   ;;  %v927_v11 = vld [vmem:[%s2635_s4] sm:$0xff] }
  0x33   : > { %828 = vperm.xlu2 %1814, %v750_v12  }
  0x39   : > { %1839 = vset.pattern.permute.xlu0 %v1875_v8 }
  0x3a   : > { %420 = vperm.xlu0 %1839, %v346_v0   ;;  %405 = vperm.xlu1 %1813, %v343_v7  }
  0x3b   : > { %1815 = vset.pattern.permute.xlu2 %v1874_v3 }
  0x3c   : > { %508 = vperm.xlu2 %1815, %v342_v13  }
  0x42   : > { %425 = vperm.xlu0 %1839, %v347_v4   ;;  %1816 = vset.pattern.permute.xlu1 %v1874_v3  ;;  %v2124_v4 = vperm.slane %v665_v56, 2 }
  0x43   : > { %512 = vperm.xlu1 %1816, %v343_v7  }
  0x44   : > { %1817 = vset.pattern.permute.xlu2 %v1873_v2 }
  0x45   : > { %642 = vperm.xlu2 %1817, %v342_v13  }
  0x4a   : > { %410 = vperm.xlu0 %1839, %v344_v6  }
  0x4b   : > { %1818 = vset.pattern.permute.xlu1 %v1875_v8 }
  0x4c   : > { %813 = vperm.xlu1 %1818, %v747_v14  }
  0x4d   : > { %1819 = vset.pattern.permute.xlu2 %v1875_v8 }
  0x4e   : > { %818 = vperm.xlu2 %1819, %v748_v15  }
  0x52   : > { %400 = vperm.xlu0 %1839, %v342_v13  }
  0x54   : > { %390 = vperm.xlu1 %1818, %v340_v5  }
  0x56   : > { %395 = vperm.xlu2 %1819, %v341_v16  }
  0x5a   : > { %808 = vperm.xlu0 %1839, %v746_v17  }
  0x5c   : > { %1821 = vset.pattern.permute.xlu1 %v1874_v3 }
  0x5d   : > { %504 = vperm.xlu1 %1821, %v341_v16  }
  0x5e   : > { %1822 = vset.pattern.permute.xlu2 %v1873_v2 }
  0x5f   : > { %634 = vperm.xlu2 %1822, %v340_v5   ;;  %v2126_v5 = vperm.slane %v666_v57, 2 }
  0x62   : > { %375 = vperm.xlu0 %1839, %v337_v18  }
  0x65   : > { %1823 = vset.pattern.permute.xlu1 %v1873_v2 }
  0x66   : > { %638 = vperm.xlu1 %1823, %v341_v16  }
  0x67   : > { %1824 = vset.pattern.permute.xlu2 %v1875_v8 }
  0x68   : > { %803 = vperm.xlu2 %1824, %v745_v19   ;;  %v2014_v21 = vpop.permute.xlu2 %658 }
  0x69   : > { %v699_v14 = vmul.f32 %v2124_v4, %v2014_v21  ;;  %v700_v15 = vmul.f32 %v2126_v5, %v2014_v21 }
  0x6a   : > { %783 = vperm.xlu0 %1839, %v741_v20  }
  0x6e   : > { %1825 = vset.pattern.permute.xlu1 %v1875_v8 }
  0x6f   : > { %380 = vperm.xlu1 %1825, %v338_v9  }
  0x70   : > { %385 = vperm.xlu2 %1824, %v339_v22   ;;  %v2026_v24 = vpop.permute.xlu2 %662 }
  0x71   : > { %v701_v21 = vmul.f32 %v2124_v4, %v2026_v24 }
  0x72   : > { %365 = vperm.xlu0 %1839, %v2023_v23  }
  0x77   : > { %1826 = vset.pattern.permute.xlu1 %v1874_v3 }
  0x78   : > { %1827 = vset.pattern.permute.xlu2 %v1874_v3  ;;  %492 = vperm.xlu1 %1826, %v338_v9  }
  0x79   : > { %496 = vperm.xlu2 %1827, %v339_v22  }
  0x7a   : > { %355 = vperm.xlu0 %1839, %v2032_v25   ;;  %v2036_v26 = vpop.permute.xlu2 %516 }
  0x7b   : > { %v561_v52 = vmul.f32 %v2112_v58, %v2036_v26  ;;  %v562_v53 = vmul.f32 %v2114_v59, %v2036_v26 }
  0x80   : > { %1828 = vset.pattern.permute.xlu1 %v1873_v2 }
  0x81   : > { %1829 = vset.pattern.permute.xlu2 %v1875_v8  ;;  %v2046_v29 = vpop.permute.xlu1 %524  ;;  %630 = vperm.xlu1 %1828, %v339_v22   ;;  %v2048_v30 = vpop.permute.xlu0 %520 }
  0x82   : > { %793 = vperm.xlu2 %1829, %v743_v27   ;;  %763 = vperm.xlu0 %1839, %v737_v28   ;;  %v565_v6 = vmul.f32 %v2112_v58, %v2046_v29  ;;  %v566_v7 = vmul.f32 %v2114_v59, %v2046_v29  ;;  %v739_v28 = vld [vmem:[%s2633_s2 + $0x20] sm:$0xff]  ;;  %v702_v29 = vmul.f32 %v2126_v5, %v2026_v24  ;;  %v1234_v24 = vld [vmem:[%s2637_s6 + $0x8] sm:$0xff] }
  0x84   : > { %v2050_v31 = vpop.permute.xlu2 %654 }
  0x85   : > { %v697_v54 = vmul.f32 %v2124_v4, %v2050_v31 }
  0x89   : > { %v2061_v35 = vpop.permute.xlu1 %528  ;;  %1830 = vset.pattern.permute.xlu1 %v1875_v8  ;;  %v2064_v36 = vpop.permute.xlu0 %500 }
  0x8a   : > { %370 = vperm.xlu2 %1829, %v336_v32   ;;  %758 = vperm.xlu0 %1839, %v736_v33   ;;  %v567_v19 = vmul.f32 %v2112_v58, %v2061_v35  ;;  %v564_v33 = vmul.f32 %v2114_v59, %v2048_v30 }
  0x8b   : > { %798 = vperm.xlu1 %1830, %v744_v34  }
  0x8d   : > { %v2069_v38 = vpop.permute.xlu2 %828 }
  0x92   : > { %1832 = vset.pattern.permute.xlu2 %v1874_v3  ;;  %1005 = vperm.xlu0 %1839, %v939_v37   ;;  %v2072_v39 = vpop.permute.xlu1 %415 }
  0x93   : > { %1831 = vset.pattern.permute.xlu1 %v1874_v3  ;;  %488 = vperm.xlu2 %1832, %v337_v18   ;;  %v2075_v40 = vpop.permute.xlu0 %646 }
  0x94   : > { %484 = vperm.xlu1 %1831, %v336_v32  }
  0x96   : > { %v2084_v42 = vpop.permute.xlu2 %508 }
  0x9a   : > { %1000 = vperm.xlu0 %1839, %v938_v41  }
  0x9b   : > { %1834 = vset.pattern.permute.xlu2 %v1873_v2  ;;  %v2087_v43 = vpop.permute.xlu1 %650  ;;  %v2089_v44 = vpop.permute.xlu0 %626 }
  0x9c   : > { %1833 = vset.pattern.permute.xlu1 %v1873_v2  ;;  %622 = vperm.xlu2 %1834, %v337_v18  }
  0x9d   : > { %618 = vperm.xlu1 %1833, %v336_v32   ;;  %v563_v32 = vmul.f32 %v2112_v58, %v2048_v30 }
  0x9f   : > { %v2104_v49 = vpop.permute.xlu2 %642 }
  0xa2   : > { %975 = vperm.xlu0 %1839, %v933_v45   ;;  %v462_v45 = vmul.f32 %v2118_v61, %v2072_v39 }
  0xa3   : > { %v2099_v47 = vpop.permute.xlu0 %610 }
  0xa4   : > { %v824_v50 = vpop.permute.xlu1 %823  ;;  %1836 = vset.pattern.permute.xlu2 %v1875_v8  ;;  %v596_v56 = vadd.f32 %v564_v33, %v462_v45  ;;  %v558_v45 = vmul.f32 %v2114_v59, %v2084_v42 }
  0xa5   : > { %1835 = vset.pattern.permute.xlu1 %v1875_v8  ;;  %360 = vperm.xlu2 %1836, %v1969_v10  }
  0xa6   : > { %788 = vperm.xlu1 %1835, %v742_v48  }
  0xa8   : > { %v2132_v9 = vpop.permute.xlu2 %818 }
  0xaa   : > { %970 = vperm.xlu0 %1839, %v932_v55  }
  0xac   : > { %v421_v62 = vpop.permute.xlu0 %420  ;;  %v2120_v63 = vpop.permute.xlu1 %405 }
  0xad   : > { %v463_v0 = vmul.f32 %v2116_v60, %v421_v62  ;;  %v464_v1 = vmul.f32 %v2118_v61, %v421_v62  ;;  %1838 = vset.pattern.permute.xlu2 %v1874_v3 }
  0xae   : > { %1837 = vset.pattern.permute.xlu1 %v1874_v3  ;;  %480 = vperm.xlu2 %1838, %v2023_v23  }
  0xaf   : > { %476 = vperm.xlu1 %1837, %v1969_v10   ;;  %v597_v12 = vadd.f32 %v565_v6, %v463_v0  ;;  %v598_v13 = vadd.f32 %v566_v7, %v464_v1  ;;  %v568_v10 = vmul.f32 %v2114_v59, %v2061_v35  ;;  %v461_v35 = vmul.f32 %v2116_v60, %v2072_v39  ;;  %v2189_v6 = vld [vmem:[%s2632_s1] sm:$0xff] }
  0xb0   : > { %v2162_v34 = vpop.permute.xlu2 %395  ;;  %v698_v39 = vmul.f32 %v2126_v5, %v2050_v31 }
  0xb1   : > { %v731_v17 = vadd.f32 %v699_v14, %v597_v12  ;;  %v732_v18 = vadd.f32 %v700_v15, %v598_v13  ;;  %v740_v13 = vld [vmem:[%s2633_s2 + $0x28] sm:$0xff] }
  0xb2   : > { %945 = vperm.xlu0 %1839, %v927_v11   ;;  %v695_v11 = vmul.f32 %v2124_v4, %v2087_v43 }
  0xb3   : > { %v859_v30 = vadd.f32 %v824_v50, %v731_v17  ;;  %v860_v46 = vadd.f32 %v824_v50, %v732_v18  ;;  %v595_v50 = vadd.f32 %v563_v32, %v461_v35  ;;  %v1237_v18 = vld [vmem:[%s2637_s6 + $0x20] sm:$0xff] }
  0xb4   : > { %v426_v16 = vpop.permute.xlu0 %425 }
  0xb5   : > { %v465_v20 = vmul.f32 %v2116_v60, %v426_v16  ;;  %v466_v22 = vmul.f32 %v2118_v61, %v426_v16  ;;  %v513_v27 = vpop.permute.xlu1 %512  ;;  %v891_v62 = vmax.f32 %v859_v30, 0.0  ;;  %v892_v0 = vmax.f32 %v860_v46, 0.0 }
  0xb6   : > { %1841 = vset.pattern.permute.xlu2 %v1875_v8  ;;  %v559_v33 = vmul.f32 %v2112_v58, %v513_v27  ;;  %v560_v35 = vmul.f32 %v2114_v59, %v513_v27 }
  0xb7   : > { %v599_v37 = vadd.f32 %v567_v19, %v465_v20  ;;  %v600_v41 = vadd.f32 %v568_v10, %v466_v22  ;;  %1840 = vset.pattern.permute.xlu1 %v1873_v2  ;;  %773 = vperm.xlu2 %1841, %v739_v28   ;;  %v729_v19 = vadd.f32 %v697_v54, %v595_v50 }
  0xb8   : > { %614 = vperm.xlu1 %1840, %v2023_v23   ;;  %v730_v10 = vadd.f32 %v698_v39, %v596_v56 }
  0xb9   : > { %v733_v48 = vadd.f32 %v701_v21, %v599_v37  ;;  %v734_v51 = vadd.f32 %v702_v29, %v600_v41  ;;  %v2201_v20 = vpop.permute.xlu2 %634  ;;  %v694_v21 = vmul.f32 %v2126_v5, %v2075_v40  ;;  %v857_v29 = vadd.f32 %v2132_v9, %v729_v19 }
  0xba   : > { %1256 = vperm.xlu0 %1839, %v1234_v24   ;;  %v858_v32 = vadd.f32 %v2132_v9, %v730_v10  ;;  %v557_v24 = vmul.f32 %v2112_v58, %v2084_v42  ;;  %v458_v9 = vmul.f32 %v2118_v61, %v2120_v63 }
  0xbb   : > { %v861_v55 = vadd.f32 %v2069_v38, %v733_v48  ;;  %v862_v23 = vadd.f32 %v2069_v38, %v734_v51  ;;  %v696_v38 = vmul.f32 %v2126_v5, %v2087_v43  ;;  %v693_v43 = vmul.f32 %v2124_v4, %v2075_v40 }
  0xbc   : > { %v411_v57 = vpop.permute.xlu0 %410  ;;  %v457_v40 = vmul.f32 %v2116_v60, %v2120_v63  ;;  %v889_v42 = vmax.f32 %v857_v29, 0.0  ;;  %v890_v54 = vmax.f32 %v858_v32, 0.0  ;;  %v941_v29 = vld [vmem:[%s2635_s4 + $0x70] sm:$0xff] }
  0xbd   : > { %v459_v1 = vmul.f32 %v2116_v60, %v411_v57  ;;  %v460_v26 = vmul.f32 %v2118_v61, %v411_v57  ;;  %v893_v7 = vmax.f32 %v861_v55, 0.0  ;;  %v894_v31 = vmax.f32 %v862_v23, 0.0 }
  0xbe   : > { %v814_v12 = vpop.permute.xlu1 %813  ;;  %v591_v55 = vadd.f32 %v559_v33, %v457_v40  ;;  %v592_v23 = vadd.f32 %v560_v35, %v458_v9  ;;  %v937_v33 = vld [vmem:[%s2635_s4 + $0x50] sm:$0xff]  ;;  %v940_v35 = vld [vmem:[%s2635_s4 + $0x68] sm:$0xff] }
  0xbf   : > { %v593_v14 = vadd.f32 %v561_v52, %v459_v1  ;;  %v594_v15 = vadd.f32 %v562_v53, %v460_v26  ;;  %v925_v16 = vpack.c.bf16 %v893_v7, %v891_v62  ;;  %v926_v17 = vpack.c.bf16 %v894_v31, %v892_v0  ;;  %350 = vperm.xlu2 %1841, %v2189_v6   ;;  %v1240_v62 = vld [vmem:[%s2637_s6 + $0x38] sm:$0xff] }
  0xc0   : > { %1842 = vset.pattern.permute.xlu1 %v1875_v8  ;;  %v691_v52 = vmul.f32 %v2124_v4, %v2104_v49  ;;  %v692_v53 = vmul.f32 %v2126_v5, %v2104_v49  ;;  %v725_v26 = vadd.f32 %v693_v43, %v591_v55  ;;  %v726_v7 = vadd.f32 %v694_v21, %v592_v23 }
  0xc1   : > { %v727_v22 = vadd.f32 %v695_v11, %v593_v14  ;;  %v728_v28 = vadd.f32 %v696_v38, %v594_v15  ;;  %778 = vperm.xlu1 %1842, %v740_v13   ;;  %1071 = vmatpush.bf16.msra.mxu0 %v925_v16 }
  0xc2   : > { %1120 = vmatpush.bf16.msra.mxu1 %v926_v17  ;;  %1271 = vperm.xlu0 %1839, %v1237_v18   ;;  %v804_v49 = vpop.permute.xlu2 %803 }
  0xc3   : > { %v855_v37 = vadd.f32 %v814_v12, %v727_v22  ;;  %v856_v41 = vadd.f32 %v814_v12, %v728_v28  ;;  %v1246_v22 = vld [vmem:[%s2637_s6 + $0x68] sm:$0xff]  ;;  %v735_v28 = vld [vmem:[%s2633_s2] sm:$0xff] }
  0xc4   : > { %v401_v30 = vpop.permute.xlu0 %400 }
  0xc5   : > { %v887_v46 = vmax.f32 %v855_v37, 0.0  ;;  %v888_v48 = vmax.f32 %v856_v41, 0.0  ;;  %v455_v51 = vmul.f32 %v2116_v60, %v401_v30  ;;  %v456_v27 = vmul.f32 %v2118_v61, %v401_v30  ;;  %v936_v41 = vld [vmem:[%s2635_s4 + $0x48] sm:$0xff] }
  0xc6   : > { %v2227_v39 = vpop.permute.xlu1 %390 }
  0xc7   : > { %v589_v63 = vadd.f32 %v557_v24, %v455_v51  ;;  %v590_v50 = vadd.f32 %v558_v45, %v456_v27  ;;  %1844 = vset.pattern.permute.xlu2 %v1874_v3  ;;  %v923_v56 = vpack.c.bf16 %v889_v42, %v887_v46  ;;  %v924_v57 = vpack.c.bf16 %v890_v54, %v888_v48  ;;  %v935_v46 = vld [vmem:[%s2635_s4 + $0x40] sm:$0xff] }
  0xc8   : > { %472 = vperm.xlu2 %1844, %v2032_v25   ;;  %v553_v24 = vmul.f32 %v2112_v58, %v2064_v36  ;;  %v554_v45 = vmul.f32 %v2114_v59, %v2064_v36  ;;  %v451_v40 = vmul.f32 %v2116_v60, %v2227_v39  ;;  %v452_v9 = vmul.f32 %v2118_v61, %v2227_v39 }
  0xc9   : > { %v723_v0 = vadd.f32 %v691_v52, %v589_v63  ;;  %v724_v1 = vadd.f32 %v692_v53, %v590_v50  ;;  %1843 = vset.pattern.permute.xlu1 %v1874_v3  ;;  %1072 = vmatpush.bf16.msra.mxu0 %v923_v56  ;;  %v1243_v3 = vld [vmem:[%s2637_s6 + $0x50] sm:$0xff]  ;;  %v687_v48 = vmul.f32 %v2124_v4, %v2201_v20 }
  0xca   : > { %1121 = vmatpush.bf16.msra.mxu1 %v924_v57  ;;  %1286 = vperm.xlu0 %1839, %v1240_v62   ;;  %v688_v51 = vmul.f32 %v2126_v5, %v2201_v20  ;;  %v585_v36 = vadd.f32 %v553_v24, %v451_v40  ;;  %v586_v27 = vadd.f32 %v554_v45, %v452_v9  ;;  %v931_v20 = vld [vmem:[%s2635_s4 + $0x20] sm:$0xff]  ;;  %v934_v62 = vld [vmem:[%s2635_s4 + $0x38] sm:$0xff] }
  0xcb   : > { %v851_v31 = vadd.f32 %v804_v49, %v723_v0  ;;  %468 = vperm.xlu1 %1843, %v2189_v6   ;;  %v852_v38 = vadd.f32 %v804_v49, %v724_v1  ;;  %v453_v42 = vmul.f32 %v2116_v60, %v2162_v34  ;;  %v454_v54 = vmul.f32 %v2118_v61, %v2162_v34  ;;  %v1236_v24 = vld [vmem:[%s2637_s6 + $0x18] sm:$0xff] }
  0xcc   : > { %v809_v11 = vpop.permute.xlu0 %808  ;;  %v719_v56 = vadd.f32 %v687_v48, %v585_v36  ;;  %v720_v57 = vadd.f32 %v688_v51, %v586_v27  ;;  %v1235_v36 = vld [vmem:[%s2637_s6 + $0x10] sm:$0xff] }
  0xcd   : > { %v853_v12 = vadd.f32 %v809_v11, %v725_v26  ;;  %v854_v13 = vadd.f32 %v809_v11, %v726_v7  ;;  %v883_v17 = vmax.f32 %v851_v31, 0.0  ;;  %v884_v18 = vmax.f32 %v852_v38, 0.0 }
  0xcf   : > { %v885_v14 = vmax.f32 %v853_v12, 0.0  ;;  %v886_v15 = vmax.f32 %v854_v13, 0.0  ;;  %v505_v16 = vpop.permute.xlu1 %504 }
  0xd0   : > { %1846 = vset.pattern.permute.xlu2 %v1873_v2  ;;  %v555_v52 = vmul.f32 %v2112_v58, %v505_v16  ;;  %v556_v53 = vmul.f32 %v2114_v59, %v505_v16 }
  0xd1   : > { %v921_v19 = vpack.c.bf16 %v885_v14, %v883_v17  ;;  %v922_v10 = vpack.c.bf16 %v886_v15, %v884_v18  ;;  %606 = vperm.xlu2 %1846, %v2032_v25   ;;  %v2253_v25 = vpop.permute.xlu2 %385  ;;  %v930_v14 = vld [vmem:[%s2635_s4 + $0x18] sm:$0xff]  ;;  %v929_v18 = vld [vmem:[%s2635_s4 + $0x10] sm:$0xff] }
  0xd2   : > { %1301 = vperm.xlu0 %1839, %v1243_v3   ;;  %v587_v63 = vadd.f32 %v555_v52, %v453_v42  ;;  %v588_v50 = vadd.f32 %v556_v53, %v454_v54  ;;  %v449_v45 = vmul.f32 %v2116_v60, %v2253_v25 }
  0xd3   : > { %1073 = vmatpush.bf16.msra.mxu0 %v921_v19  ;;  %1845 = vset.pattern.permute.xlu1 %v1873_v2  ;;  %v738_v2 = vld [vmem:[%s2633_s2 + $0x18] sm:$0xff]  ;;  %v1233_v19 = vld [vmem:[%s2637_s6] sm:$0xff] }
  0xd4   : > { %1122 = vmatpush.bf16.msra.mxu1 %v922_v10  ;;  %602 = vperm.xlu1 %1845, %v2189_v6   ;;  %v942_v6 = vld [vmem:[%s2635_s4 + $0x78] sm:$0xff] }
  0xd8   : > { %v639_v43 = vpop.permute.xlu1 %638 }
  0xd9   : > { %1848 = vset.pattern.permute.xlu2 %v1875_v8  ;;  %v2264_v32 = vpop.permute.xlu2 %496  ;;  %v689_v39 = vmul.f32 %v2124_v4, %v639_v43  ;;  %v690_v55 = vmul.f32 %v2126_v5, %v639_v43 }
  0xda   : > { %1316 = vperm.xlu0 %1839, %v1246_v22   ;;  %753 = vperm.xlu2 %1848, %v735_v28   ;;  %v928_v22 = vld [vmem:[%s2635_s4 + $0x8] sm:$0xff]  ;;  %v376_v28 = vpop.permute.xlu0 %375  ;;  %v551_v40 = vmul.f32 %v2112_v58, %v2264_v32  ;;  %v552_v9 = vmul.f32 %v2114_v59, %v2264_v32 }
  0xdb   : > { %v721_v1 = vadd.f32 %v689_v39, %v587_v63  ;;  %v722_v49 = vadd.f32 %v690_v55, %v588_v50 }
  0xdc   : > { %1847 = vset.pattern.permute.xlu1 %v1875_v8 }
  0xdd   : > { %768 = vperm.xlu1 %1847, %v738_v2  }
  0xe1   : > { %v2259_v21 = vpop.permute.xlu1 %380  ;;  %v794_v37 = vpop.permute.xlu2 %793 }
  0xe2   : > { %1020 = vperm.xlu2 %1848, %v942_v6   ;;  %v847_v34 = vadd.f32 %v794_v37, %v719_v56  ;;  %v848_v0 = vadd.f32 %v794_v37, %v720_v57  ;;  %v447_v6 = vmul.f32 %v2116_v60, %v2259_v21  ;;  %v784_v52 = vpop.permute.xlu0 %783  ;;  %v1238_v57 = vld [vmem:[%s2637_s6 + $0x28] sm:$0xff] }
  0xe4   : > { %v879_v11 = vmax.f32 %v847_v34, 0.0  ;;  %v880_v38 = vmax.f32 %v848_v0, 0.0 }
  0xe5   : > { %1015 = vperm.xlu1 %1847, %v941_v29   ;;  %v448_v29 = vmul.f32 %v2118_v61, %v2259_v21  ;;  %v450_v21 = vmul.f32 %v2118_v61, %v2253_v25  ;;  %v583_v25 = vadd.f32 %v551_v40, %v449_v45 }
  0xe7   : > { %v584_v27 = vadd.f32 %v552_v9, %v450_v21 }
  0xe9   : > { %v2300_v23 = vpop.permute.xlu2 %370 }
  0xea   : > { %v493_v8 = vpop.permute.xlu1 %492  ;;  %995 = vperm.xlu2 %1848, %v937_v33  }
  0xeb   : > { %v549_v10 = vmul.f32 %v2112_v58, %v493_v8  ;;  %v550_v43 = vmul.f32 %v2114_v59, %v493_v8  ;;  %v683_v8 = vmul.f32 %v2124_v4, %v2089_v44 }
  0xed   : > { %1010 = vperm.xlu1 %1847, %v940_v35   ;;  %v581_v33 = vadd.f32 %v549_v10, %v447_v6  ;;  %v582_v35 = vadd.f32 %v550_v43, %v448_v29 }
  0xf1   : > { %v2311_v15 = vpop.permute.xlu2 %488 }
  0xf2   : > { %990 = vperm.xlu2 %1848, %v936_v41   ;;  %v684_v41 = vmul.f32 %v2126_v5, %v2089_v44 }
  0xf3   : > { %v2283_v30 = vpop.permute.xlu1 %630 }
  0xf4   : > { %v716_v48 = vadd.f32 %v684_v41, %v582_v35  ;;  %v685_v44 = vmul.f32 %v2124_v4, %v2283_v30  ;;  %v686_v51 = vmul.f32 %v2126_v5, %v2283_v30  ;;  %v1239_v30 = vld [vmem:[%s2637_s6 + $0x30] sm:$0xff] }
  0xf5   : > { %985 = vperm.xlu1 %1847, %v935_v46   ;;  %v715_v46 = vadd.f32 %v683_v8, %v581_v33 }
  0xf6   : > { %v717_v32 = vadd.f32 %v685_v44, %v583_v25  ;;  %v718_v42 = vadd.f32 %v686_v51, %v584_v27  ;;  %v844_v39 = vadd.f32 %v784_v52, %v716_v48  ;;  %v1247_v48 = vld [vmem:[%s2637_s6 + $0x70] sm:$0xff]  ;;  %v366_v44 = vpop.permute.xlu0 %365 }
  0xf7   : > { %v843_v54 = vadd.f32 %v784_v52, %v715_v46 }
  0xf8   : > { %v876_v34 = vmax.f32 %v844_v39, 0.0 }
  0xf9   : > { %v2324_v2 = vpop.permute.xlu2 %622 }
  0xfa   : > { %965 = vperm.xlu2 %1848, %v931_v20   ;;  %v681_v35 = vmul.f32 %v2124_v4, %v2324_v2 }
  0xfd   : > { %v799_v26 = vpop.permute.xlu1 %798  ;;  %980 = vperm.xlu1 %1847, %v934_v62   ;;  %v875_v62 = vmax.f32 %v843_v54, 0.0 }
  0xfe   : > { %v849_v7 = vadd.f32 %v799_v26, %v721_v1  ;;  %v850_v31 = vadd.f32 %v799_v26, %v722_v49  ;;  %v1242_v26 = vld [vmem:[%s2637_s6 + $0x48] sm:$0xff]  ;;  %v356_v39 = vpop.permute.xlu0 %355 }
 0x100   : > { %v881_v12 = vmax.f32 %v849_v7, 0.0  ;;  %v882_v13 = vmax.f32 %v850_v31, 0.0  ;;  %v1241_v31 = vld [vmem:[%s2637_s6 + $0x40] sm:$0xff] }
 0x101   : > { %v2352_v53 = vpop.permute.xlu2 %360 }
 0x102   : > { %v919_v16 = vpack.c.bf16 %v881_v12, %v879_v11  ;;  %v920_v17 = vpack.c.bf16 %v882_v13, %v880_v38  ;;  %960 = vperm.xlu2 %1848, %v930_v14   ;;  %v1245_v13 = vld [vmem:[%s2637_s6 + $0x60] sm:$0xff]  ;;  %v445_v14 = vmul.f32 %v2116_v60, %v376_v28 }
 0x104   : > { %1074 = vmatpush.bf16.msra.mxu0 %v919_v16  ;;  %1123 = vmatpush.bf16.msra.mxu1 %v920_v17  ;;  %v446_v16 = vmul.f32 %v2118_v61, %v376_v28  ;;  %v547_v17 = vmul.f32 %v2112_v58, %v2311_v15  ;;  %v1244_v28 = vld [vmem:[%s2637_s6 + $0x58] sm:$0xff] }
 0x105   : > { %955 = vperm.xlu1 %1847, %v929_v18   ;;  %v548_v18 = vmul.f32 %v2114_v59, %v2311_v15 }
 0x106   : > { %v485_v3 = vpop.permute.xlu1 %484  ;;  %v579_v15 = vadd.f32 %v547_v17, %v445_v14 }
 0x107   : > { %v545_v11 = vmul.f32 %v2112_v58, %v485_v3  ;;  %v546_v38 = vmul.f32 %v2114_v59, %v485_v3  ;;  %v444_v3 = vmul.f32 %v2118_v61, %v2300_v23  ;;  %v580_v33 = vadd.f32 %v548_v18, %v446_v16 }
 0x108   : > { %v713_v40 = vadd.f32 %v681_v35, %v579_v15 }
 0x109   : > { %v2360_v49 = vpop.permute.xlu2 %480  ;;  %v578_v29 = vadd.f32 %v546_v38, %v444_v3 }
 0x10a   : > { %1251 = vperm.xlu2 %1848, %v1233_v19   ;;  %v443_v19 = vmul.f32 %v2116_v60, %v2300_v23  ;;  %v682_v23 = vmul.f32 %v2126_v5, %v2324_v2 }
 0x10c   : > { %v577_v6 = vadd.f32 %v545_v11, %v443_v19  ;;  %v714_v9 = vadd.f32 %v682_v23, %v580_v33 }
 0x10d   : > { %950 = vperm.xlu1 %1847, %v928_v22  }
 0x10f   : > { %v619_v37 = vpop.permute.xlu1 %618 }
 0x110   : > { %v679_v10 = vmul.f32 %v2124_v4, %v619_v37  ;;  %v680_v43 = vmul.f32 %v2126_v5, %v619_v37  ;;  %v1248_v37 = vld [vmem:[%s2637_s6 + $0x78] sm:$0xff] }
 0x111   : > { %v774_v12 = vpop.permute.xlu2 %773 }
 0x112   : > { %1266 = vperm.xlu2 %1848, %v1236_v24   ;;  %v711_v8 = vadd.f32 %v679_v10, %v577_v6  ;;  %v712_v41 = vadd.f32 %v680_v43, %v578_v29 }
 0x114   : > { %v839_v24 = vadd.f32 %v774_v12, %v711_v8  ;;  %v840_v45 = vadd.f32 %v774_v12, %v712_v41  ;;  %v764_v12 = vpop.permute.xlu0 %763 }
 0x115   : > { %1261 = vperm.xlu1 %1847, %v1235_v36  }
 0x116   : > { %v871_v36 = vmax.f32 %v839_v24, 0.0  ;;  %v872_v25 = vmax.f32 %v840_v45, 0.0 }
 0x118   : > { %v789_v55 = vpop.permute.xlu1 %788 }
 0x119   : > { %v845_v20 = vadd.f32 %v789_v55, %v717_v32  ;;  %v846_v63 = vadd.f32 %v789_v55, %v718_v42  ;;  %v351_v21 = vpop.permute.xlu2 %350 }
 0x11a   : > { %1281 = vperm.xlu2 %1848, %v1239_v30   ;;  %v435_v14 = vmul.f32 %v2116_v60, %v351_v21  ;;  %v436_v16 = vmul.f32 %v2118_v61, %v351_v21 }
 0x11b   : > { %v877_v50 = vmax.f32 %v845_v20, 0.0  ;;  %v878_v56 = vmax.f32 %v846_v63, 0.0  ;;  %v439_v63 = vmul.f32 %v2116_v60, %v2352_v53 }
 0x11d   : > { %v917_v0 = vpack.c.bf16 %v877_v50, %v875_v62  ;;  %v918_v1 = vpack.c.bf16 %v878_v56, %v876_v34  ;;  %1276 = vperm.xlu1 %1847, %v1238_v57   ;;  %v440_v50 = vmul.f32 %v2118_v61, %v2352_v53  ;;  %v675_v56 = vmul.f32 %v2124_v4, %v2099_v47 }
 0x11e   : > { %v676_v57 = vmul.f32 %v2126_v5, %v2099_v47  ;;  %v441_v62 = vmul.f32 %v2116_v60, %v366_v44  ;;  %v442_v34 = vmul.f32 %v2118_v61, %v366_v44  ;;  %v543_v47 = vmul.f32 %v2112_v58, %v2360_v49 }
 0x11f   : > { %1075 = vmatpush.bf16.msra.mxu0 %v917_v0  ;;  %1124 = vmatpush.bf16.msra.mxu1 %v918_v1 }
 0x120   : > { %v575_v29 = vadd.f32 %v543_v47, %v441_v62  ;;  %v1766_v62 = vld [vmem:[%s2634_s3 + $0x20] sm:$0xff] }
 0x121   : > { %v477_v7 = vpop.permute.xlu1 %476 }
 0x122   : > { %1296 = vperm.xlu2 %1848, %v1242_v26   ;;  %v473_v54 = vpop.permute.xlu2 %472  ;;  %v541_v30 = vmul.f32 %v2112_v58, %v477_v7  ;;  %v542_v20 = vmul.f32 %v2114_v59, %v477_v7  ;;  %v437_v7 = vmul.f32 %v2116_v60, %v356_v39 }
 0x123   : > { %v539_v17 = vmul.f32 %v2112_v58, %v473_v54  ;;  %v540_v18 = vmul.f32 %v2114_v59, %v473_v54 }
 0x124   : > { %v573_v0 = vadd.f32 %v541_v30, %v439_v63  ;;  %v574_v1 = vadd.f32 %v542_v20, %v440_v50  ;;  %v1762_v63 = vld [vmem:[%s2634_s3] sm:$0xff]  ;;  %v1763_v50 = vld [vmem:[%s2634_s3 + $0x8] sm:$0xff] }
 0x125   : > { %1291 = vperm.xlu1 %1847, %v1241_v31   ;;  %v438_v31 = vmul.f32 %v2118_v61, %v356_v39  ;;  %v571_v15 = vadd.f32 %v539_v17, %v437_v7  ;;  %v1768_v7 = vld [vmem:[%s2634_s3 + $0x30] sm:$0xff] }
 0x126   : > { %v707_v10 = vadd.f32 %v675_v56, %v573_v0  ;;  %v708_v43 = vadd.f32 %v676_v57, %v574_v1  ;;  %v1764_v56 = vld [vmem:[%s2634_s3 + $0x10] sm:$0xff]  ;;  %v1765_v57 = vld [vmem:[%s2634_s3 + $0x18] sm:$0xff] }
 0x127   : > { %v572_v33 = vadd.f32 %v540_v18, %v438_v31 }
 0x128   : > { %v835_v8 = vadd.f32 %v764_v12, %v707_v10  ;;  %v836_v41 = vadd.f32 %v764_v12, %v708_v43 }
 0x12a   : > { %v2385_v22 = vpop.permute.xlu1 %614  ;;  %1311 = vperm.xlu2 %1848, %v1245_v13   ;;  %v544_v13 = vmul.f32 %v2114_v59, %v2360_v49  ;;  %v867_v44 = vmax.f32 %v835_v8, 0.0 }
 0x12b   : > { %v607_v26 = vpop.permute.xlu2 %606  ;;  %v678_v49 = vmul.f32 %v2126_v5, %v2385_v22 }
 0x12c   : > { %v673_v60 = vmul.f32 %v2124_v4, %v607_v26  ;;  %v674_v61 = vmul.f32 %v2126_v5, %v607_v26 }
 0x12d   : > { %1306 = vperm.xlu1 %1847, %v1244_v28   ;;  %v677_v28 = vmul.f32 %v2124_v4, %v2385_v22 }
 0x12e   : > { %v706_v24 = vadd.f32 %v674_v61, %v572_v33 }
 0x12f   : > { %v709_v45 = vadd.f32 %v677_v28, %v575_v29 }
 0x132   : > { %1326 = vperm.xlu2 %1848, %v1248_v37   ;;  %v705_v37 = vadd.f32 %v673_v60, %v571_v15 }
 0x133   : > { %v779_v46 = vpop.permute.xlu1 %778 }
 0x134   : > { %v841_v2 = vadd.f32 %v779_v46, %v713_v40  ;;  %v842_v51 = vadd.f32 %v779_v46, %v714_v9  ;;  %v754_v40 = vpop.permute.xlu2 %753 }
 0x135   : > { %1321 = vperm.xlu1 %1847, %v1247_v48   ;;  %v759_v48 = vpop.permute.xlu0 %758 }
 0x136   : > { %v873_v27 = vmax.f32 %v841_v2, 0.0  ;;  %v874_v52 = vmax.f32 %v842_v51, 0.0  ;;  %v868_v2 = vmax.f32 %v836_v41, 0.0 }
 0x138   : > { %v915_v32 = vpack.c.bf16 %v873_v27, %v871_v36  ;;  %v916_v42 = vpack.c.bf16 %v874_v52, %v872_v25  ;;  %v833_v25 = vadd.f32 %v759_v48, %v705_v37  ;;  %v834_v27 = vadd.f32 %v759_v48, %v706_v24 }
 0x13a   : > { %1076 = vmatpush.bf16.msra.mxu0 %v915_v32  ;;  %1125 = vmatpush.bf16.msra.mxu1 %v916_v42  ;;  %v865_v39 = vmax.f32 %v833_v25, 0.0 }
 0x13d   : > { %v469_v55 = vpop.permute.xlu1 %468  ;;  %v2452_v1 = vpop.permute.xlu0 %1005 }
 0x13e   : > { %v537_v11 = vmul.f32 %v2112_v58, %v469_v55  ;;  %v538_v53 = vmul.f32 %v2114_v59, %v469_v55  ;;  %v576_v59 = vadd.f32 %v544_v13, %v442_v34  ;;  %v866_v55 = vmax.f32 %v834_v27, 0.0  ;;  %v1767_v34 = vld [vmem:[%s2634_s3 + $0x28] sm:$0xff] }
 0x140   : > { %v569_v6 = vadd.f32 %v537_v11, %v435_v14  ;;  %v570_v58 = vadd.f32 %v538_v53, %v436_v16  ;;  %v710_v21 = vadd.f32 %v678_v49, %v576_v59  ;;  %v2463_v53 = vpop.permute.xlu2 %1020 }
 0x145   : > { %v2459_v31 = vpop.permute.xlu0 %1000 }
 0x146   : > { %v603_v38 = vpop.permute.xlu1 %602 }
 0x147   : > { %v671_v19 = vmul.f32 %v2124_v4, %v603_v38  ;;  %v672_v3 = vmul.f32 %v2126_v5, %v603_v38  ;;  %v1769_v38 = vld [vmem:[%s2634_s3 + $0x38] sm:$0xff] }
 0x148   : > { %v2468_v13 = vpop.permute.xlu2 %995 }
 0x149   : > { %v703_v35 = vadd.f32 %v671_v19, %v569_v6  ;;  %v704_v23 = vadd.f32 %v672_v3, %v570_v58 }
 0x14b   : > { %v831_v46 = vadd.f32 %v754_v40, %v703_v35  ;;  %v832_v5 = vadd.f32 %v754_v40, %v704_v23 }
 0x14d   : > { %v863_v42 = vmax.f32 %v831_v46, 0.0  ;;  %v864_v54 = vmax.f32 %v832_v5, 0.0  ;;  %v976_v12 = vpop.permute.xlu0 %975 }
 0x14f   : > { %v769_v22 = vpop.permute.xlu1 %768  ;;  %v911_v30 = vpack.c.bf16 %v865_v39, %v863_v42  ;;  %v912_v20 = vpack.c.bf16 %v866_v55, %v864_v54 }
 0x150   : > { %v837_v9 = vadd.f32 %v769_v22, %v709_v45  ;;  %v838_v4 = vadd.f32 %v769_v22, %v710_v21  ;;  %v2470_v19 = vpop.permute.xlu2 %990 }
 0x152   : > { %v869_v51 = vmax.f32 %v837_v9, 0.0  ;;  %v870_v36 = vmax.f32 %v838_v4, 0.0 }
 0x154   : > { %v913_v52 = vpack.c.bf16 %v869_v51, %v867_v44  ;;  %v914_v32 = vpack.c.bf16 %v870_v36, %v868_v2 }
 0x155   : > { %v971_v14 = vpop.permute.xlu0 %970 }
 0x156   : > { %1077 = vmatpush.bf16.msra.mxu0 %v913_v52  ;;  %1126 = vmatpush.bf16.msra.mxu1 %v914_v32 }
 0x157   : > { %v2450_v0 = vpop.permute.xlu1 %1015 }
 0x158   : > { %v966_v33 = vpop.permute.xlu2 %965 }
 0x15a   : > { %1078 = vmatpush.bf16.msra.mxu0 %v911_v30  ;;  %1127 = vmatpush.bf16.msra.mxu1 %v912_v20 }
 0x15d   : > { %1079 = vmatmul.bf16.vlgmr.msra.gmra.mxu0 %v1762_v63  ;;  %1128 = vmatmul.bf16.vlgmr.msra.gmra.mxu1 %v1762_v63  ;;  %v946_v3 = vpop.permute.xlu0 %945 }
 0x15f   : > { %v2454_v26 = vpop.permute.xlu1 %1010 }
 0x160   : > { %v961_v37 = vpop.permute.xlu2 %960 }
 0x167   : > { %v2461_v11 = vpop.permute.xlu1 %985 }
 0x16d   : > { %1084 = vmatmul.bf16.gmra.mxu0 %v1763_v50  ;;  %1133 = vmatmul.bf16.gmra.mxu1 %v1763_v50 }
 0x16f   : > { %v981_v47 = vpop.permute.xlu1 %980 }
 0x177   : > { %v956_v16 = vpop.permute.xlu1 %955 }
 0x17d   : > { %1089 = vmatmul.bf16.gmra.mxu0 %v1764_v56  ;;  %1138 = vmatmul.bf16.gmra.mxu1 %v1764_v56 }
 0x17f   : > { %v951_v10 = vpop.permute.xlu1 %950 }
 0x18d   : > { %1094 = vmatmul.bf16.gmra.mxu0 %v1765_v57  ;;  %1143 = vmatmul.bf16.gmra.mxu1 %v1765_v57 }
 0x19d   : > { %1099 = vmatmul.bf16.gmra.mxu0 %v1766_v62  ;;  %1148 = vmatmul.bf16.gmra.mxu1 %v1766_v62 }
 0x1ad   : > { %1104 = vmatmul.bf16.gmra.mxu0 %v1767_v34  ;;  %1153 = vmatmul.bf16.gmra.mxu1 %v1767_v34 }
 0x1bd   : > { %1109 = vmatmul.bf16.gmra.mxu0 %v1768_v7  ;;  %1158 = vmatmul.bf16.gmra.mxu1 %v1768_v7 }
 0x1cd   : > { %1114 = vmatmul.bf16.gmra.mxu0 %v1769_v38  ;;  %1163 = vmatmul.bf16.gmra.mxu1 %v1769_v38 }
 0x1da   : > { %v1080_v17 = vpop.f32.mrf.mxu0  ;;  %v1129_v18 = vpop.f32.mrf.mxu1 }
 0x1db   : > { %v1081_v43 = vadd.f32 %v1080_v17, %v946_v3  ;;  %v1130_v28 = vadd.f32 %v1129_v18, %v946_v3 }
 0x1dd   : > { %v1169_v58 = vmax.f32 %v1081_v43, 0.0  ;;  %v1170_v29 = vmax.f32 %v1130_v28, 0.0 }
 0x1e2   : > { %v1082_v49 = vpop.f32.mrf.mxu0  ;;  %v1131_v60 = vpop.f32.mrf.mxu1 }
 0x1e3   : > { %v1083_v61 = vadd.f32 %v1082_v49, %v951_v10  ;;  %v1132_v6 = vadd.f32 %v1131_v60, %v951_v10 }
 0x1e5   : > { %v1171_v59 = vmax.f32 %v1083_v61, 0.0  ;;  %v1172_v15 = vmax.f32 %v1132_v6, 0.0 }
 0x1e7   : > { %v2472_v35 = vpack.c.bf16 %v1171_v59, %v1169_v58  ;;  %v2474_v23 = vpack.c.bf16 %v1172_v15, %v1170_v29 }
 0x1ea   : > { %v1085_v8 = vpop.f32.mrf.mxu0  ;;  %v1134_v41 = vpop.f32.mrf.mxu1 }
 0x1eb   : > { %v1086_v24 = vadd.f32 %v1085_v8, %v956_v16  ;;  %v1135_v45 = vadd.f32 %v1134_v41, %v956_v16 }
 0x1ed   : > { %v1173_v4 = vmax.f32 %v1086_v24, 0.0  ;;  %v1174_v46 = vmax.f32 %v1135_v45, 0.0 }
 0x1f2   : > { %v1087_v21 = vpop.f32.mrf.mxu0  ;;  %v1136_v40 = vpop.f32.mrf.mxu1 }
 0x1f3   : > { %v1088_v22 = vadd.f32 %v1087_v21, %v961_v37  ;;  %v1137_v9 = vadd.f32 %v1136_v40, %v961_v37 }
 0x1f5   : > { %v1175_v5 = vmax.f32 %v1088_v22, 0.0  ;;  %v1176_v48 = vmax.f32 %v1137_v9, 0.0 }
 0x1f7   : > { %v2476_v44 = vpack.c.bf16 %v1175_v5, %v1173_v4  ;;  %v2478_v2 = vpack.c.bf16 %v1176_v48, %v1174_v46 }
 0x1fa   : > { %v1090_v51 = vpop.f32.mrf.mxu0  ;;  %v1139_v36 = vpop.f32.mrf.mxu1 }
 0x1fb   : > { %v1091_v25 = vadd.f32 %v1090_v51, %v966_v33  ;;  %v1140_v27 = vadd.f32 %v1139_v36, %v966_v33 }
 0x1fd   : > { %v1177_v39 = vmax.f32 %v1091_v25, 0.0  ;;  %v1178_v55 = vmax.f32 %v1140_v27, 0.0 }
 0x202   : > { %v1092_v52 = vpop.f32.mrf.mxu0  ;;  %v1141_v32 = vpop.f32.mrf.mxu1 }
 0x203   : > { %v1093_v42 = vadd.f32 %v1092_v52, %v971_v14  ;;  %v1142_v54 = vadd.f32 %v1141_v32, %v971_v14 }
 0x205   : > { %v1179_v30 = vmax.f32 %v1093_v42, 0.0  ;;  %v1180_v20 = vmax.f32 %v1142_v54, 0.0 }
 0x207   : > { %v2480_v63 = vpack.c.bf16 %v1179_v30, %v1177_v39  ;;  %v2482_v50 = vpack.c.bf16 %v1180_v20, %v1178_v55 }
 0x20a   : > { %v1095_v56 = vpop.f32.mrf.mxu0  ;;  %v1144_v57 = vpop.f32.mrf.mxu1 }
 0x20b   : > { %v1096_v62 = vadd.f32 %v1095_v56, %v976_v12  ;;  %v1145_v34 = vadd.f32 %v1144_v57, %v976_v12 }
 0x20d   : > { %v1181_v18 = vmax.f32 %v1096_v62, 0.0  ;;  %v1182_v3 = vmax.f32 %v1145_v34, 0.0 }
 0x212   : > { %v1097_v7 = vpop.f32.mrf.mxu0  ;;  %v1146_v38 = vpop.f32.mrf.mxu1 }
 0x213   : > { %v1098_v16 = vadd.f32 %v1097_v7, %v981_v47  ;;  %v1147_v17 = vadd.f32 %v1146_v38, %v981_v47 }
 0x215   : > { %v1183_v10 = vmax.f32 %v1098_v16, 0.0  ;;  %v1184_v14 = vmax.f32 %v1147_v17, 0.0 }
 0x217   : > { %v2484_v43 = vpack.c.bf16 %v1183_v10, %v1181_v18  ;;  %v2486_v28 = vpack.c.bf16 %v1184_v14, %v1182_v3 }
 0x21a   : > { %v1100_v49 = vpop.f32.mrf.mxu0  ;;  %v1149_v60 = vpop.f32.mrf.mxu1 }
 0x21b   : > { %v1101_v34 = vadd.f32 %v1100_v49, %v2461_v11  ;;  %v1150_v7 = vadd.f32 %v1149_v60, %v2461_v11  ;;  %v1770_v11 = vld [vmem:[%s2636_s5] sm:$0xff] }
 0x21d   : > { %v1185_v10 = vmax.f32 %v1101_v34, 0.0  ;;  %v1186_v14 = vmax.f32 %v1150_v7, 0.0 }
 0x222   : > { %v1102_v61 = vpop.f32.mrf.mxu0  ;;  %v1151_v6 = vpop.f32.mrf.mxu1 }
 0x223   : > { %v1152_v20 = vadd.f32 %v1151_v6, %v2470_v19 }
 0x225   : > { %v1188_v17 = vmax.f32 %v1152_v20, 0.0 }
 0x22a   : > { %v1105_v58 = vpop.f32.mrf.mxu0  ;;  %v1154_v29 = vpop.f32.mrf.mxu1 }
 0x22b   : > { %v1106_v39 = vadd.f32 %v1105_v58, %v2468_v13 }
 0x22d   : > { %v1189_v38 = vmax.f32 %v1106_v39, 0.0 }
 0x232   : > { %v1107_v59 = vpop.f32.mrf.mxu0  ;;  %v1156_v12 = vpop.f32.mrf.mxu1 }
 0x233   : > { %v1157_v52 = vadd.f32 %v1156_v12, %v2459_v31 }
 0x235   : > { %v1192_v57 = vmax.f32 %v1157_v52, 0.0 }
 0x23a   : > { %v1110_v15 = vpop.f32.mrf.mxu0  ;;  %v1159_v33 = vpop.f32.mrf.mxu1 }
 0x23b   : > { %v1111_v5 = vadd.f32 %v1110_v15, %v2452_v1  ;;  %v1160_v48 = vadd.f32 %v1159_v33, %v2452_v1  ;;  %v1103_v1 = vadd.f32 %v1102_v61, %v2470_v19  ;;  %v1226_v61 = vpack.c.bf16 %v1188_v17, %v1186_v14 }
 0x23d   : > { %v1193_v55 = vmax.f32 %v1111_v5, 0.0  ;;  %v1194_v30 = vmax.f32 %v1160_v48, 0.0 }
 0x242   : > { %v1112_v8 = vpop.f32.mrf.mxu0  ;;  %v1161_v47 = vpop.f32.mrf.mxu1 }
 0x243   : > { %v1113_v22 = vadd.f32 %v1112_v8, %v2454_v26  ;;  %v1162_v9 = vadd.f32 %v1161_v47, %v2454_v26 }
 0x245   : > { %v1195_v32 = vmax.f32 %v1113_v22, 0.0  ;;  %v1196_v42 = vmax.f32 %v1162_v9, 0.0 }
 0x247   : > { %v1229_v62 = vpack.c.bf16 %v1195_v32, %v1193_v55 }
 0x24a   : > { %v1115_v41 = vpop.f32.mrf.mxu0  ;;  %v1164_v37 = vpop.f32.mrf.mxu1 }
 0x24b   : > { %v1116_v24 = vadd.f32 %v1115_v41, %v2450_v0  ;;  %v1165_v45 = vadd.f32 %v1164_v37, %v2450_v0  ;;  %v1108_v0 = vadd.f32 %v1107_v59, %v2459_v31  ;;  %v1230_v31 = vpack.c.bf16 %v1196_v42, %v1194_v30  ;;  %v1257_v59 = vpop.permute.xlu0 %1256  ;;  %v1262_v41 = vpop.permute.xlu1 %1261 }
 0x24d   : > { %v1197_v51 = vmax.f32 %v1116_v24, 0.0  ;;  %v1198_v36 = vmax.f32 %v1165_v45, 0.0  ;;  %v1191_v56 = vmax.f32 %v1108_v0, 0.0 }
 0x24f   : > { %v1227_v18 = vpack.c.bf16 %v1191_v56, %v1189_v38 }
 0x252   : > { %v1117_v21 = vpop.f32.mrf.mxu0  ;;  %v1166_v40 = vpop.f32.mrf.mxu1 }
 0x253   : > { %v1118_v4 = vadd.f32 %v1117_v21, %v2463_v53  ;;  %v1167_v46 = vadd.f32 %v1166_v40, %v2463_v53  ;;  %v1155_v53 = vadd.f32 %v1154_v29, %v2468_v13  ;;  %v1187_v13 = vmax.f32 %v1103_v1, 0.0  ;;  %v1277_v32 = vpop.permute.xlu1 %1276 }
 0x255   : > { %v1199_v25 = vmax.f32 %v1118_v4, 0.0  ;;  %v1200_v27 = vmax.f32 %v1167_v46, 0.0  ;;  %v1190_v16 = vmax.f32 %v1155_v53, 0.0  ;;  %v1225_v19 = vpack.c.bf16 %v1187_v13, %v1185_v10 }
 0x257   : > { %v1231_v54 = vpack.c.bf16 %v1199_v25, %v1197_v51  ;;  %v1232_v26 = vpack.c.bf16 %v1200_v27, %v1198_v36  ;;  %v1228_v3 = vpack.c.bf16 %v1192_v57, %v1190_v16  ;;  %v1272_v51 = vpop.permute.xlu0 %1271 }
 0x259   : > { %1377 = vmatpush.bf16.msra.mxu2 %v1231_v54  ;;  %1426 = vmatpush.bf16.msra.mxu3 %v1232_v26 }
 0x25b   : > { %v1292_v13 = vpop.permute.xlu1 %1291 }
 0x25d   : > { %1378 = vmatpush.bf16.msra.mxu2 %v1229_v62  ;;  %1427 = vmatpush.bf16.msra.mxu3 %v1230_v31 }
 0x25f   : > { %v1287_v62 = vpop.permute.xlu0 %1286 }
 0x261   : > { %1379 = vmatpush.bf16.msra.mxu2 %v1227_v18  ;;  %1428 = vmatpush.bf16.msra.mxu3 %v1228_v3 }
 0x265   : > { %1380 = vmatpush.bf16.msra.mxu2 %v1225_v19  ;;  %1429 = vmatpush.bf16.msra.mxu3 %v1226_v61 }
 0x269   : > { %1381 = vmatpush.bf16.msra.mxu2 %v2484_v43  ;;  %1430 = vmatpush.bf16.msra.mxu3 %v2486_v28  ;;  %v1777_v43 = vld [vmem:[%s2636_s5 + $0x38] sm:$0xff]  ;;  %v1252_v28 = vpop.permute.xlu2 %1251 }
 0x26d   : > { %1382 = vmatpush.bf16.msra.mxu2 %v2480_v63  ;;  %1431 = vmatpush.bf16.msra.mxu3 %v2482_v50  ;;  %v1771_v63 = vld [vmem:[%s2636_s5 + $0x8] sm:$0xff]  ;;  %v1776_v50 = vld [vmem:[%s2636_s5 + $0x30] sm:$0xff] }
 0x271   : > { %1383 = vmatpush.bf16.msra.mxu2 %v2476_v44  ;;  %1432 = vmatpush.bf16.msra.mxu3 %v2478_v2  ;;  %v1772_v44 = vld [vmem:[%s2636_s5 + $0x10] sm:$0xff]  ;;  %v1775_v2 = vld [vmem:[%s2636_s5 + $0x28] sm:$0xff]  ;;  %v1267_v22 = vpop.permute.xlu2 %1266 }
 0x275   : > { %1384 = vmatpush.bf16.msra.mxu2 %v2472_v35  ;;  %1433 = vmatpush.bf16.msra.mxu3 %v2474_v23  ;;  %v1773_v35 = vld [vmem:[%s2636_s5 + $0x18] sm:$0xff]  ;;  %v1774_v23 = vld [vmem:[%s2636_s5 + $0x20] sm:$0xff] }
 0x278   : > { %1385 = vmatmul.bf16.vlgmr.msra.gmra.mxu2 %v1770_v11  ;;  %1434 = vmatmul.bf16.vlgmr.msra.gmra.mxu3 %v1770_v11 }
 0x279   : > { %v1282_v55 = vpop.permute.xlu2 %1281 }
 0x281   : > { %v1297_v19 = vpop.permute.xlu2 %1296 }
 0x288   : > { %1390 = vmatmul.bf16.gmra.mxu2 %v1771_v63  ;;  %1439 = vmatmul.bf16.gmra.mxu3 %v1771_v63 }
 0x298   : > { %1395 = vmatmul.bf16.gmra.mxu2 %v1772_v44  ;;  %1444 = vmatmul.bf16.gmra.mxu3 %v1772_v44 }
 0x2a8   : > { %1400 = vmatmul.bf16.gmra.mxu2 %v1773_v35  ;;  %1449 = vmatmul.bf16.gmra.mxu3 %v1773_v35 }
 0x2b8   : > { %1405 = vmatmul.bf16.gmra.mxu2 %v1774_v23  ;;  %1454 = vmatmul.bf16.gmra.mxu3 %v1774_v23  ;;  %v1302_v23 = vpop.permute.xlu0 %1301 }
 0x2c8   : > { %1410 = vmatmul.bf16.gmra.mxu2 %v1775_v2  ;;  %1459 = vmatmul.bf16.gmra.mxu3 %v1775_v2 }
 0x2d8   : > { %1415 = vmatmul.bf16.gmra.mxu2 %v1776_v50  ;;  %1464 = vmatmul.bf16.gmra.mxu3 %v1776_v50 }
 0x2e8   : > { %1420 = vmatmul.bf16.gmra.mxu2 %v1777_v43  ;;  %1469 = vmatmul.bf16.gmra.mxu3 %v1777_v43 }
 0x2fb   : > { %v1386_v49 = vpop.f32.mrf.mxu2  ;;  %v1435_v60 = vpop.f32.mrf.mxu3 }
 0x2fc   : > { %v1387_v6 = vadd.f32 %v1386_v49, %v1252_v28  ;;  %v1436_v58 = vadd.f32 %v1435_v60, %v1252_v28  ;;  %v1876_v49 = vmov -inf  }
 0x2fd   : > { %1528 = vst.msk [vmem:[%s2540_s20] sm:$0xff] %vm1527_vm0, %v1876_v49 }
 0x2fe   : > { %v1475_v29 = vmax.f32 %v1387_v6, %v1436_v58  ;;  %1529 = vst.msk [vmem:[%s2540_s20 + $0x8] sm:$0xff] %vm1527_vm0, %v1876_v49  ;;  %v1307_v6 = vpop.permute.xlu1 %1306 }
 0x2ff   : > { %1530 = vst.msk [vmem:[%s2540_s20 + $0x10] sm:$0xff] %vm1527_vm0, %v1876_v49 }
 0x300   : > { %1476 = vmax.xlane.f32.xlu0 %v1475_v29  ;;  %1531 = vst.msk [vmem:[%s2540_s20 + $0x18] sm:$0xff] %vm1527_vm0, %v1876_v49 }
 0x301   : > { %1532 = vst.msk [vmem:[%s2540_s20 + $0x20] sm:$0xff] %vm1527_vm0, %v1876_v49 }
 0x302   : > { %1533 = vst.msk [vmem:[%s2540_s20 + $0x28] sm:$0xff] %vm1527_vm0, %v1876_v49 }
 0x303   : > { %v1388_v12 = vpop.f32.mrf.mxu2  ;;  %v1437_v15 = vpop.f32.mrf.mxu3  ;;  %1534 = vst.msk [vmem:[%s2540_s20 + $0x30] sm:$0xff] %vm1527_vm0, %v1876_v49 }
 0x304   : > { %v1389_v33 = vadd.f32 %v1388_v12, %v1257_v59  ;;  %v1438_v8 = vadd.f32 %v1437_v15, %v1257_v59  ;;  %1535 = vst.msk [vmem:[%s2540_s20 + $0x38] sm:$0xff] %vm1527_vm0, %v1876_v49 }
 0x305   : > { %1536 = vst.msk [vmem:[%s2540_s20 + $0x40] sm:$0xff] %vm1527_vm0, %v1876_v49 }
 0x306   : > { %v1478_v47 = vmax.f32 %v1389_v33, %v1438_v8  ;;  %1537 = vst.msk [vmem:[%s2540_s20 + $0x48] sm:$0xff] %vm1527_vm0, %v1876_v49  ;;  %v1312_v33 = vpop.permute.xlu2 %1311 }
 0x307   : > { %1538 = vst.msk [vmem:[%s2540_s20 + $0x50] sm:$0xff] %vm1527_vm0, %v1876_v49 }
 0x308   : > { %1479 = vmax.xlane.f32.xlu1 %v1478_v47  ;;  %1539 = vst.msk [vmem:[%s2540_s20 + $0x58] sm:$0xff] %vm1527_vm0, %v1876_v49 }
 0x309   : > { %1540 = vst.msk [vmem:[%s2540_s20 + $0x60] sm:$0xff] %vm1527_vm0, %v1876_v49 }
 0x30a   : > { %1541 = vst.msk [vmem:[%s2540_s20 + $0x68] sm:$0xff] %vm1527_vm0, %v1876_v49 }
 0x30b   : > { %v1391_v37 = vpop.f32.mrf.mxu2  ;;  %v1440_v24 = vpop.f32.mrf.mxu3  ;;  %1542 = vst.msk [vmem:[%s2540_s20 + $0x70] sm:$0xff] %vm1527_vm0, %v1876_v49 }
 0x30c   : > { %v1392_v45 = vadd.f32 %v1391_v37, %v1262_v41  ;;  %v1441_v21 = vadd.f32 %v1440_v24, %v1262_v41  ;;  %1543 = vst.msk [vmem:[%s2540_s20 + $0x78] sm:$0xff] %vm1527_vm0, %v1876_v49 }
 0x30e   : > { %v1481_v40 = vmax.f32 %v1392_v45, %v1441_v21  ;;  %v1317_v45 = vpop.permute.xlu0 %1316 }
 0x310   : > { %1482 = vmax.xlane.f32.xlu2 %v1481_v40 }
 0x313   : > { %v1393_v9 = vpop.f32.mrf.mxu2  ;;  %v1442_v4 = vpop.f32.mrf.mxu3 }
 0x314   : > { %v1394_v46 = vadd.f32 %v1393_v9, %v1267_v22  ;;  %v1443_v5 = vadd.f32 %v1442_v4, %v1267_v22 }
 0x316   : > { %v1484_v48 = vmax.f32 %v1394_v46, %v1443_v5  ;;  %v1322_v46 = vpop.permute.xlu1 %1321 }
 0x318   : > { %1485 = vmax.xlane.f32.xlu2 %v1484_v48 }
 0x31b   : > { %v1396_v36 = vpop.f32.mrf.mxu2  ;;  %v1445_v25 = vpop.f32.mrf.mxu3 }
 0x31c   : > { %v1397_v27 = vadd.f32 %v1396_v36, %v1272_v51  ;;  %v1446_v0 = vadd.f32 %v1445_v25, %v1272_v51 }
 0x31e   : > { %v1487_v52 = vmax.f32 %v1397_v27, %v1446_v0  ;;  %v1327_v27 = vpop.permute.xlu2 %1326  ;;  %v1544_v0 = vld [vmem:[%s2540_s20] sm:$0xff] }
 0x320   : > { %1488 = vmax.xlane.f32.xlu0 %v1487_v52 }
 0x323   : > { %v1398_v42 = vpop.f32.mrf.mxu2  ;;  %v1447_v54 = vpop.f32.mrf.mxu3 }
 0x324   : > { %v1399_v26 = vadd.f32 %v1398_v42, %v1277_v32  ;;  %v1448_v39 = vadd.f32 %v1447_v54, %v1277_v32 }
 0x326   : > { %v1490_v53 = vmax.f32 %v1399_v26, %v1448_v39 }
 0x328   : > { %1491 = vmax.xlane.f32.xlu1 %v1490_v53 }
 0x32b   : > { %v1401_v30 = vpop.f32.mrf.mxu2  ;;  %v1450_v1 = vpop.f32.mrf.mxu3 }
 0x32c   : > { %v1402_v20 = vadd.f32 %v1401_v30, %v1282_v55  ;;  %v1451_v56 = vadd.f32 %v1450_v1, %v1282_v55  ;;  %v1545_v55 = vld [vmem:[%s2540_s20 + $0x8] sm:$0xff] }
 0x32e   : > { %v1493_v57 = vmax.f32 %v1402_v20, %v1451_v56  ;;  %v1546_v20 = vld [vmem:[%s2540_s20 + $0x10] sm:$0xff] }
 0x330   : > { %1494 = vmax.xlane.f32.xlu2 %v1493_v57 }
 0x333   : > { %v1403_v31 = vpop.f32.mrf.mxu2  ;;  %v1452_v34 = vpop.f32.mrf.mxu3 }
 0x334   : > { %v1404_v7 = vadd.f32 %v1403_v31, %v1287_v62  ;;  %v1453_v38 = vadd.f32 %v1452_v34, %v1287_v62  ;;  %v1547_v62 = vld [vmem:[%s2540_s20 + $0x18] sm:$0xff] }
 0x336   : > { %v1496_v16 = vmax.f32 %v1404_v7, %v1453_v38  ;;  %v1548_v7 = vld [vmem:[%s2540_s20 + $0x20] sm:$0xff] }
 0x338   : > { %1497 = vmax.xlane.f32.xlu0 %v1496_v16 }
 0x33b   : > { %v1406_v17 = vpop.f32.mrf.mxu2  ;;  %v1455_v18 = vpop.f32.mrf.mxu3 }
 0x33c   : > { %v1407_v3 = vadd.f32 %v1406_v17, %v1292_v13  ;;  %v1456_v10 = vadd.f32 %v1455_v18, %v1292_v13  ;;  %v1549_v13 = vld [vmem:[%s2540_s20 + $0x28] sm:$0xff] }
 0x33e   : > { %v1499_v14 = vmax.f32 %v1407_v3, %v1456_v10  ;;  %v1550_v3 = vld [vmem:[%s2540_s20 + $0x30] sm:$0xff] }
 0x340   : > { %1500 = vmax.xlane.f32.xlu1 %v1499_v14 }
 0x343   : > { %v1408_v61 = vpop.f32.mrf.mxu2  ;;  %v1457_v11 = vpop.f32.mrf.mxu3 }
 0x344   : > { %v1409_v63 = vadd.f32 %v1408_v61, %v1297_v19  ;;  %v1458_v44 = vadd.f32 %v1457_v11, %v1297_v19  ;;  %v1551_v19 = vld [vmem:[%s2540_s20 + $0x38] sm:$0xff] }
 0x346   : > { %v1502_v35 = vmax.f32 %v1409_v63, %v1458_v44  ;;  %v1552_v63 = vld [vmem:[%s2540_s20 + $0x40] sm:$0xff] }
 0x348   : > { %1503 = vmax.xlane.f32.xlu2 %v1502_v35 }
 0x34b   : > { %v1411_v2 = vpop.f32.mrf.mxu2  ;;  %v1460_v50 = vpop.f32.mrf.mxu3 }
 0x34c   : > { %v1412_v43 = vadd.f32 %v1411_v2, %v1302_v23  ;;  %v1461_v28 = vadd.f32 %v1460_v50, %v1302_v23  ;;  %v1553_v23 = vld [vmem:[%s2540_s20 + $0x48] sm:$0xff] }
 0x34e   : > { %v1505_v60 = vmax.f32 %v1412_v43, %v1461_v28  ;;  %v1554_v43 = vld [vmem:[%s2540_s20 + $0x50] sm:$0xff] }
 0x350   : > { %1506 = vmax.xlane.f32.xlu0 %v1505_v60  ;;  %v1555_v60 = vld [vmem:[%s2540_s20 + $0x58] sm:$0xff] }
 0x353   : > { %v1413_v58 = vpop.f32.mrf.mxu2  ;;  %v1462_v29 = vpop.f32.mrf.mxu3 }
 0x354   : > { %v1414_v59 = vadd.f32 %v1413_v58, %v1307_v6  ;;  %v1463_v12 = vadd.f32 %v1462_v29, %v1307_v6  ;;  %v1556_v29 = vld [vmem:[%s2540_s20 + $0x60] sm:$0xff] }
 0x356   : > { %v1508_v15 = vmax.f32 %v1414_v59, %v1463_v12 }
 0x358   : > { %1509 = vmax.xlane.f32.xlu1 %v1508_v15  ;;  %v1557_v15 = vld [vmem:[%s2540_s20 + $0x68] sm:$0xff] }
 0x35b   : > { %v1416_v8 = vpop.f32.mrf.mxu2  ;;  %v1465_v47 = vpop.f32.mrf.mxu3 }
 0x35c   : > { %v1417_v41 = vadd.f32 %v1416_v8, %v1312_v33  ;;  %v1466_v37 = vadd.f32 %v1465_v47, %v1312_v33  ;;  %v1558_v47 = vld [vmem:[%s2540_s20 + $0x70] sm:$0xff] }
 0x35e   : > { %v1511_v24 = vmax.f32 %v1417_v41, %v1466_v37 }
 0x360   : > { %1512 = vmax.xlane.f32.xlu2 %v1511_v24  ;;  %v1559_v24 = vld [vmem:[%s2540_s20 + $0x78] sm:$0xff] }
 0x363   : > { %v1418_v21 = vpop.f32.mrf.mxu2  ;;  %v1467_v40 = vpop.f32.mrf.mxu3 }
 0x364   : > { %v1419_v22 = vadd.f32 %v1418_v21, %v1317_v45  ;;  %v1468_v9 = vadd.f32 %v1467_v40, %v1317_v45 }
 0x366   : > { %v1514_v4 = vmax.f32 %v1419_v22, %v1468_v9 }
 0x368   : > { %1515 = vmax.xlane.f32.xlu0 %v1514_v4 }
 0x36b   : > { %v1421_v5 = vpop.f32.mrf.mxu2  ;;  %v1470_v48 = vpop.f32.mrf.mxu3 }
 0x36c   : > { %v1422_v51 = vadd.f32 %v1421_v5, %v1322_v46  ;;  %v1471_v36 = vadd.f32 %v1470_v48, %v1322_v46 }
 0x36e   : > { %v1517_v25 = vmax.f32 %v1422_v51, %v1471_v36 }
 0x370   : > { %1518 = vmax.xlane.f32.xlu1 %v1517_v25 }
 0x373   : > { %v1423_v52 = vpop.f32.mrf.mxu2  ;;  %v1472_v32 = vpop.f32.mrf.mxu3 }
 0x374   : > { %v1424_v42 = vadd.f32 %v1423_v52, %v1327_v27  ;;  %v1473_v54 = vadd.f32 %v1472_v32, %v1327_v27  ;;  %v1477_v26 = vpop.xlane.xlu0 %1476 }
 0x375   : > { %v1560_v39 = vmax.f32 %v1544_v0, %v1477_v26 }
 0x376   : > { %v1520_v53 = vmax.f32 %v1424_v42, %v1473_v54 }
 0x377   : > { %1577 = vst.msk [vmem:[%s2540_s20] sm:$0xff] %vm1527_vm0, %v1560_v39 }
 0x378   : > { %1521 = vmax.xlane.f32.xlu2 %v1520_v53 }
 0x37b   : > { %v1480_v30 = vpop.xlane.xlu1 %1479 }
 0x37c   : > { %v1561_v1 = vmax.f32 %v1545_v55, %v1480_v30 }
 0x37e   : > { %1578 = vst.msk [vmem:[%s2540_s20 + $0x8] sm:$0xff] %vm1527_vm0, %v1561_v1 }
 0x383   : > { %v1483_v56 = vpop.xlane.xlu2 %1482 }
 0x384   : > { %v1562_v57 = vmax.f32 %v1546_v20, %v1483_v56 }
 0x386   : > { %1579 = vst.msk [vmem:[%s2540_s20 + $0x10] sm:$0xff] %vm1527_vm0, %v1562_v57 }
 0x38b   : > { %v1486_v31 = vpop.xlane.xlu2 %1485 }
 0x38c   : > { %v1563_v34 = vmax.f32 %v1547_v62, %v1486_v31 }
 0x38e   : > { %1580 = vst.msk [vmem:[%s2540_s20 + $0x18] sm:$0xff] %vm1527_vm0, %v1563_v34 }
 0x393   : > { %v1489_v38 = vpop.xlane.xlu0 %1488 }
 0x394   : > { %v1564_v16 = vmax.f32 %v1548_v7, %v1489_v38 }
 0x396   : > { %1581 = vst.msk [vmem:[%s2540_s20 + $0x20] sm:$0xff] %vm1527_vm0, %v1564_v16 }
 0x39b   : > { %v1492_v17 = vpop.xlane.xlu1 %1491 }
 0x39c   : > { %v1565_v18 = vmax.f32 %v1549_v13, %v1492_v17 }
 0x39e   : > { %1582 = vst.msk [vmem:[%s2540_s20 + $0x28] sm:$0xff] %vm1527_vm0, %v1565_v18 }
 0x3a3   : > { %v1495_v10 = vpop.xlane.xlu2 %1494 }
 0x3a4   : > { %v1566_v14 = vmax.f32 %v1550_v3, %v1495_v10 }
 0x3a6   : > { %1583 = vst.msk [vmem:[%s2540_s20 + $0x30] sm:$0xff] %vm1527_vm0, %v1566_v14 }
 0x3ab   : > { %v1498_v61 = vpop.xlane.xlu0 %1497 }
 0x3ac   : > { %v1567_v11 = vmax.f32 %v1551_v19, %v1498_v61 }
 0x3ae   : > { %1584 = vst.msk [vmem:[%s2540_s20 + $0x38] sm:$0xff] %vm1527_vm0, %v1567_v11 }
 0x3b3   : > { %v1501_v44 = vpop.xlane.xlu1 %1500 }
 0x3b4   : > { %v1568_v35 = vmax.f32 %v1552_v63, %v1501_v44 }
 0x3b6   : > { %1585 = vst.msk [vmem:[%s2540_s20 + $0x40] sm:$0xff] %vm1527_vm0, %v1568_v35 }
 0x3bb   : > { %v1504_v2 = vpop.xlane.xlu2 %1503 }
 0x3bc   : > { %v1569_v50 = vmax.f32 %v1553_v23, %v1504_v2 }
 0x3be   : > { %1586 = vst.msk [vmem:[%s2540_s20 + $0x48] sm:$0xff] %vm1527_vm0, %v1569_v50 }
 0x3c3   : > { %v1507_v28 = vpop.xlane.xlu0 %1506 }
 0x3c4   : > { %v1570_v49 = vmax.f32 %v1554_v43, %v1507_v28 }
 0x3c6   : > { %1587 = vst.msk [vmem:[%s2540_s20 + $0x50] sm:$0xff] %vm1527_vm0, %v1570_v49 }
 0x3cb   : > { %v1510_v6 = vpop.xlane.xlu1 %1509 }
 0x3cc   : > { %v1571_v58 = vmax.f32 %v1555_v60, %v1510_v6 }
 0x3ce   : > { %1588 = vst.msk [vmem:[%s2540_s20 + $0x58] sm:$0xff] %vm1527_vm0, %v1571_v58 }
 0x3d3   : > { %v1513_v59 = vpop.xlane.xlu2 %1512 }
 0x3d4   : > { %v1572_v12 = vmax.f32 %v1556_v29, %v1513_v59 }
 0x3d6   : > { %1589 = vst.msk [vmem:[%s2540_s20 + $0x60] sm:$0xff] %vm1527_vm0, %v1572_v12 }
 0x3db   : > { %v1516_v33 = vpop.xlane.xlu0 %1515 }
 0x3dc   : > { %v1573_v8 = vmax.f32 %v1557_v15, %v1516_v33 }
 0x3de   : > { %1590 = vst.msk [vmem:[%s2540_s20 + $0x68] sm:$0xff] %vm1527_vm0, %v1573_v8 }
 0x3e3   : > { %v1519_v41 = vpop.xlane.xlu1 %1518 }
 0x3e4   : > { %v1574_v37 = vmax.f32 %v1558_v47, %v1519_v41 }
 0x3e6   : > { %1591 = vst.msk [vmem:[%s2540_s20 + $0x70] sm:$0xff] %vm1527_vm0, %v1574_v37 }
 0x3eb   : > { %v1522_v45 = vpop.xlane.xlu2 %1521 }
 0x3ec   : > { %v1575_v21 = vmax.f32 %v1559_v24, %v1522_v45 }
 0x3ee   : > { %1592 = vst.msk [vmem:[%s2540_s20 + $0x78] sm:$0xff] %vm1527_vm0, %v1575_v21 }
 0x3ef PF: > { %s17_s26 = sadd.s32 1, %s1871_s26   ;;  %s2639_s24 = smov %s1867_s25 }
 0x3f0   : > { %p14_p5 = scmp.ge.s32.totalorder %s17_s26, 4   ;;  %s2640_s25 = smov %s2642_s27 }
 0x3f2   :  { %16 = sbr.rel (!%p14_p5) target bundleno = 2 (0x2), region = 82 }

</bundles_post_ra>
